<compile_context>
chip_gen: v6e
topology: v6e:2x2x1
jax: 0.10.0
libtpu: 0.0.40
codegen_flags: <defaults>
</compile_context>

<pallas_src>
import functools

import jax
import jax.numpy as jnp
from jax import lax
from jax.experimental import pallas as pl
from jax.experimental.pallas import tpu as pltpu


# ----------------------------------------------------------------------------- kernel
def sage_fused_kernel(a_ref, batch_ref, x_ref,
                      wlr_ref, bl_ref, w2_ref, b2_ref, gamma_ref, beta_ref,
                      hw1_ref, hb1_ref, hw2_ref, hb2_ref, hw3_ref, hb3_ref,
                      out1_ref, probs_ref, *, num_nodes, n_classes):
    N = a_ref.shape[0]
    Dp = x_ref.shape[1]
    G = out1_ref.shape[0]
    Hp = out1_ref.shape[1]

    def gnn_block(amat16, x, l):
        # SAGEConv(aggr='add', normalize=True, root_weight=True) -> Linear -> LeakyReLU -> BN
        x16 = x.astype(jnp.bfloat16)
        agg = jnp.dot(amat16, x16, preferred_element_type=jnp.float32)
        # fused root+neighbor projection: [agg | x] @ [Wl ; Wr]  (one K = 2*Dp MXU pass)
        cat = jnp.concatenate([agg.astype(jnp.bfloat16), x16], axis=1)
        h = jnp.dot(cat, wlr_ref[l], preferred_element_type=jnp.float32) + bl_ref[l]
        # L2 normalize (eps on squared norm == 1e-12 on the norm) via one EUP rsqrt
        ss = jnp.sum(h * h, axis=-1, keepdims=True)
        h = h * lax.rsqrt(jnp.maximum(ss, 1e-24))
        # nn.Linear
        h = jnp.dot(h.astype(jnp.bfloat16), w2_ref[l],
                    preferred_element_type=jnp.float32) + b2_ref[l]
        # nn.LeakyReLU(0.2)
        h = jnp.maximum(h, 0.2 * h)
        # nn.BatchNorm1d (batch statistics, biased var, eps=1e-5)
        mean = jnp.mean(h, axis=0, keepdims=True)
        var = jnp.mean((h - mean) ** 2, axis=0, keepdims=True)
        return (h - mean) * lax.rsqrt(var + 1e-5) * gamma_ref[l] + beta_ref[l]

    a16 = a_ref[...]                              # bf16 0/1 edge counts, fed to MXU directly
    z = x_ref[...]
    # self.convs holds the SAME conv block twice (shared weights); residual adds.
    z = z + gnn_block(a16, z, 0)
    z = z + gnn_block(a16, z, 0)

    # ---- knn(z, z, k=2, batch, batch): nearest *other* node within the same graph ----
    sq = jnp.sum(z * z, axis=-1, keepdims=True)                      # (N, 1)
    gram = lax.dot_general(z, z, (((1,), (1,)), ((), ())),           # NT matmul, no transpose
                           preferred_element_type=jnp.float32)       # (N, N)
    d2 = sq + sq.T - 2.0 * gram
    b_row = batch_ref[...].astype(jnp.float32)                       # (1, N)
    b_mat = jnp.broadcast_to(b_row, (N, N))                          # batch[j] along lanes
    same = b_mat == b_mat.T                                          # batch[i] == batch[j]
    ri = lax.broadcasted_iota(jnp.int32, (N, N), 0)
    ci = lax.broadcasted_iota(jnp.int32, (N, N), 1)
    d2m = jnp.where(jnp.logical_and(same, ri != ci), d2, jnp.inf)
    dmin = jnp.min(d2m, axis=1, keepdims=True)
    cf = ci.astype(jnp.float32)
    # first-occurrence argmin (matches jnp.argmin); exact in f32 for N < 2^24.
    # NOTE: assumes every graph has >= 2 nodes (same assumption as the reference knn/odd-mask).
    nn2 = jnp.min(jnp.where(d2m <= dmin, cf, jnp.float32(N)), axis=1, keepdims=True)

    # One-hot gather / scatter matrices built in-register (no HBM adjacency, no XLA scatter).
    p = (cf == nn2).astype(jnp.float32)        # P[i, j] = (j == nn2[i]);  P @ X = X[nn2]
    pt16 = p.T.astype(jnp.bfloat16)            # P^T = directed line-graph adjacency (dst x src)

    z_upd = jnp.dot(p, z, preferred_element_type=jnp.float32)      # z[nn2]   (exact gather)
    tgt = jnp.dot(p, z_upd, preferred_element_type=jnp.float32)    # z[nn2][nn2]
    xl = z_upd + tgt                                               # line-graph node features

    zl = gnn_block(pt16, xl, 1)   # conv1
    zl = gnn_block(pt16, zl, 2)   # conv2

    # ---- fused head: per-graph flatten as a per-node dot accumulation (no relayout) ----
    zg = zl.reshape(G, num_nodes, Dp)
    h = jnp.zeros((G, Hp), jnp.float32)
    for n in range(num_nodes):
        h = h + jnp.dot(zg[:, n, :].astype(jnp.bfloat16), hw1_ref[n],
                        preferred_element_type=jnp.float32)
    h = h + hb1_ref[...]
    h = jnp.maximum(h, 0.2 * h)
    h = jnp.dot(h.astype(jnp.bfloat16), hw2_ref[...],
                preferred_element_type=jnp.float32) + hb2_ref[...]
    out1 = jnp.maximum(h, 0.2 * h)
    out1_ref[...] = out1

    # vbllayer (DiscClassification) point-estimate logits -> softmax over real classes only
    logits = jnp.dot(out1.astype(jnp.bfloat16), hw3_ref[...],
                     preferred_element_type=jnp.float32) + hb3_ref[...]
    lane = lax.broadcasted_iota(jnp.int32, logits.shape, 1)
    logits = jnp.where(lane < n_classes, logits, jnp.float32(-1e30))
    m = jnp.max(logits, axis=-1, keepdims=True)
    e = jnp.exp(logits - m)
    probs_ref[...] = e / jnp.sum(e, axis=-1, keepdims=True)   # exact division


# ----------------------------------------------------------------------------- wrapper
def sage_fused(A, batch_row, x_pad, params, G, num_nodes, num_classes):
    gnn = params["gnn"]
    head = params["head"]
    Hp = head["b1"].shape[1]
    kernel = functools.partial(sage_fused_kernel, num_nodes=num_nodes, n_classes=num_classes)
    vmem = pl.BlockSpec(memory_space=pltpu.MemorySpace.VMEM)
    return pl.pallas_call(
        kernel,
        out_shape=(jax.ShapeDtypeStruct((G, Hp), jnp.float32),
                   jax.ShapeDtypeStruct((G, Hp), jnp.float32)),
        in_specs=[vmem] * 15,
        out_specs=(vmem, vmem),
        compiler_params=pltpu.CompilerParams(vmem_limit_bytes=64 * 1024 * 1024),
    )(A, batch_row, x_pad,
      gnn["wlr"], gnn["bl"], gnn["w2"], gnn["b2"], gnn["gamma"], gnn["beta"],
      head["w1"], head["b1"], head["w2"], head["b2"], head["w3"], head["b3"])


# ----------------------------------------------------------------------------- model
def sage_forward(params, x, edge_index, edge_attr, batch, num_nodes):
    meta = params["meta"]
    N, D = x.shape
    Dp = meta["Dp"]

    # Dense adjacency A[i, j] = #edges j -> i (so A @ X = 'add' aggregation), built in bf16.
    A = (jnp.zeros((N, N), jnp.bfloat16)
         .at[edge_index[1], edge_index[0]].add(jnp.bfloat16(1.0)))
    x_pad = jnp.zeros((N, Dp), jnp.float32).at[:, :D].set(x)
    batch_row = batch.astype(jnp.int32).reshape(1, N)
    _ = jnp.abs(edge_attr)  # edge_attr only passes through abs+gather in the reference; unused by outputs

    G = N // num_nodes
    out1_p, probs_p = sage_fused(A, batch_row, x_pad, params, G, num_nodes, meta["num_classes"])
    out1 = out1_p[:, :meta["h2"]]
    probs = probs_p[:, :meta["num_classes"]]
    loss_set = None  # TODO(synk): VBLL train_loss_fn closure has no Pallas equivalent
    return probs, loss_set, out1


# ----------------------------------------------------------------------------- params
def init_params(key, D, num_nodes, Dp=128, h1=64, h2=32, num_classes=2, Hp=128):
    ks = jax.random.split(key, 7)

    def block_params(k):
        kk = jax.random.split(k, 4)
        return dict(
            wl=0.1 * jax.random.normal(kk[0], (D, D), jnp.float32),
            bl=jnp.zeros((D,), jnp.float32),
            wr=0.1 * jax.random.normal(kk[1], (D, D), jnp.float32),
            w2=0.1 * jax.random.normal(kk[2], (D, D), jnp.float32),
            b2=0.01 * jax.random.normal(kk[3], (D,), jnp.float32),
            gamma=jnp.ones((D,), jnp.float32),
            beta=jnp.zeros((D,), jnp.float32),
        )

    blocks = [block_params(ks[i]) for i in range(3)]

    def pad_lr(wl, wr):
        # stacked [Wl ; Wr] for the fused [agg | x] projection (K = 2*Dp)
        m = jnp.zeros((2 * Dp, Dp), jnp.float32)
        return m.at[:D, :D].set(wl).at[Dp:Dp + D, :D].set(wr)

    def pad_mat(w):
        return jnp.zeros((Dp, Dp), jnp.float32).at[:D, :D].set(w)

    def pad_vec(v):
        return jnp.zeros((1, Dp), jnp.float32).at[0, :D].set(v)

    gnn = dict(
        wlr=jnp.stack([pad_lr(b["wl"], b["wr"]) for b in blocks]).astype(jnp.bfloat16),
        bl=jnp.stack([pad_vec(b["bl"]) for b in blocks]),
        w2=jnp.stack([pad_mat(b["w2"]) for b in blocks]).astype(jnp.bfloat16),
        b2=jnp.stack([pad_vec(b["b2"]) for b in blocks]),
        gamma=jnp.stack([pad_vec(b["gamma"]) for b in blocks]),
        beta=jnp.stack([pad_vec(b["beta"]) for b in blocks]),
    )

    flat = num_nodes * D
    w1 = 0.1 * jax.random.normal(ks[3], (flat, h1), jnp.float32)
    b1 = jnp.zeros((h1,), jnp.float32)
    w2 = 0.1 * jax.random.normal(ks[4], (h1, h2), jnp.float32)
    b2 = jnp.zeros((h2,), jnp.float32)
    w3 = 0.1 * jax.random.normal(ks[5], (h2, num_classes), jnp.float32)
    b3 = 0.01 * jax.random.normal(ks[6], (num_classes,), jnp.float32)

    # head layer-1 stored per-node: (num_nodes, Dp, Hp); only [:D, :h1] rows/cols are real,
    # padding rows multiply the zero padding lanes of z, so results match the unpadded math.
    w1p = (jnp.zeros((num_nodes, Dp, Hp), jnp.float32)
           .at[:, :D, :h1].set(w1.reshape(num_nodes, D, h1))).astype(jnp.bfloat16)
    head = dict(
        w1=w1p,
        b1=jnp.zeros((1, Hp), jnp.float32).at[0, :h1].set(b1),
        w2=jnp.zeros((Hp, Hp), jnp.float32).at[:h1, :h2].set(w2).astype(jnp.bfloat16),
        b2=jnp.zeros((1, Hp), jnp.float32).at[0, :h2].set(b2),
        w3=jnp.zeros((Hp, Hp), jnp.float32).at[:h2, :num_classes].set(w3).astype(jnp.bfloat16),
        b3=jnp.zeros((1, Hp), jnp.float32).at[0, :num_classes].set(b3),
    )

    return dict(gnn=gnn, head=head,
                meta=dict(D=D, Dp=Dp, h1=h1, h2=h2, num_classes=num_classes, Hp=Hp))


# ----------------------------------------------------------------------------- main
if __name__ == "__main__":
    key = jax.random.PRNGKey(0)
    num_graphs, num_nodes, D = 2, 8, 8
    N = num_graphs * num_nodes

    # deterministic ring graph per sub-graph (both directions), E = 2 * N
    edges = []
    for g in range(num_graphs):
        base = g * num_nodes
        for i in range(num_nodes):
            edges.append((base + i, base + (i + 1) % num_nodes))
            edges.append((base + (i + 1) % num_nodes, base + i))
    edge_index = jnp.array(edges, dtype=jnp.int32).T            # (2, E): [src; tgt]
    E = edge_index.shape[1]

    ks = jax.random.split(key, 3)
    x = jax.random.normal(ks[0], (N, D), jnp.float32)
    edge_attr = jax.random.normal(ks[1], (E,), jnp.float32)
    batch = jnp.repeat(jnp.arange(num_graphs, dtype=jnp.int32), num_nodes)

    params = init_params(ks[2], D, num_nodes)

    probs, loss_set, out1 = sage_forward(params, x, edge_index, edge_attr, batch, num_nodes)
    jax.block_until_ready((probs, out1))

    assert probs.shape == (num_graphs, 2)
    assert out1.shape == (num_graphs, 32)
    assert bool(jnp.all(jnp.isfinite(probs))) and bool(jnp.all(jnp.isfinite(out1)))
    print("KERNEL_OK")
</pallas_src>

<mosaic_0001>
module attributes {stable_mosaic.version = 11 : i64} {
  func.func @sage_fused_kernel(%arg0: memref<16x16xbf16, #tpu.memory_space<vmem>>, %arg1: memref<1x16xi32, #tpu.memory_space<vmem>>, %arg2: memref<16x128xf32, #tpu.memory_space<vmem>>, %arg3: memref<3x256x128xbf16, #tpu.memory_space<vmem>>, %arg4: memref<3x1x128xf32, #tpu.memory_space<vmem>>, %arg5: memref<3x128x128xbf16, #tpu.memory_space<vmem>>, %arg6: memref<3x1x128xf32, #tpu.memory_space<vmem>>, %arg7: memref<3x1x128xf32, #tpu.memory_space<vmem>>, %arg8: memref<3x1x128xf32, #tpu.memory_space<vmem>>, %arg9: memref<8x128x128xbf16, #tpu.memory_space<vmem>>, %arg10: memref<1x128xf32, #tpu.memory_space<vmem>>, %arg11: memref<128x128xbf16, #tpu.memory_space<vmem>>, %arg12: memref<1x128xf32, #tpu.memory_space<vmem>>, %arg13: memref<128x128xbf16, #tpu.memory_space<vmem>>, %arg14: memref<1x128xf32, #tpu.memory_space<vmem>>, %arg15: memref<2x128xf32, #tpu.memory_space<vmem>>, %arg16: memref<2x128xf32, #tpu.memory_space<vmem>>) attributes {dimension_semantics = [], scalar_prefetch = 0 : i64, scratch_operands = 0 : i64, tpu.core_type = #tpu.core_type<tc>} {
    %c0 = arith.constant 0 : index
    %c0_0 = arith.constant 0 : index
    %0 = vector.load %arg0[%c0, %c0_0] : memref<16x16xbf16, #tpu.memory_space<vmem>>, vector<16x16xbf16>
    %c0_1 = arith.constant 0 : index
    %c0_2 = arith.constant 0 : index
    %1 = vector.load %arg2[%c0_1, %c0_2] : memref<16x128xf32, #tpu.memory_space<vmem>>, vector<16x128xf32>
    %2 = arith.truncf %1 : vector<16x128xf32> to vector<16x128xbf16>
    %cst = arith.constant dense<0.000000e+00> : vector<16x128xf32>
    %3 = tpu.matmul %0, %2, %cst {dimension_numbers = #tpu.dot_dimension_numbers<[1], [0], [0], [1], [0, 0, 1, 1], [], []>} : vector<16x16xbf16>, vector<16x128xbf16>, vector<16x128xf32> -> vector<16x128xf32>
    %4 = arith.truncf %3 : vector<16x128xf32> to vector<16x128xbf16>
    %5 = tpu.concatenate %4, %2 in 1 : vector<16x128xbf16>, vector<16x128xbf16> -> vector<16x256xbf16>
    %c0_3 = arith.constant 0 : index
    %c0_4 = arith.constant 0 : index
    %c0_5 = arith.constant 0 : index
    %6 = vector.load %arg3[%c0_3, %c0_4, %c0_5] : memref<3x256x128xbf16, #tpu.memory_space<vmem>>, vector<1x256x128xbf16>
    %7 = vector.shape_cast %6 : vector<1x256x128xbf16> to vector<256x128xbf16>
    %cst_6 = arith.constant dense<0.000000e+00> : vector<16x128xf32>
    %8 = tpu.matmul %5, %7, %cst_6 {dimension_numbers = #tpu.dot_dimension_numbers<[1], [0], [0], [1], [0, 0, 1, 1], [], []>} : vector<16x256xbf16>, vector<256x128xbf16>, vector<16x128xf32> -> vector<16x128xf32>
    %c0_7 = arith.constant 0 : index
    %c0_8 = arith.constant 0 : index
    %c0_9 = arith.constant 0 : index
    %9 = vector.load %arg4[%c0_7, %c0_8, %c0_9] : memref<3x1x128xf32, #tpu.memory_space<vmem>>, vector<1x1x128xf32>
    %10 = vector.shape_cast %9 : vector<1x1x128xf32> to vector<1x128xf32>
    %11 = vector.broadcast %10 : vector<1x128xf32> to vector<16x128xf32>
    %12 = arith.addf %8, %11 : vector<16x128xf32>
    %13 = arith.mulf %12, %12 : vector<16x128xf32>
    %cst_10 = arith.constant dense<0.000000e+00> : vector<16xf32>
    %14 = vector.multi_reduction <add>, %13, %cst_10 [1] : vector<16x128xf32> to vector<16xf32>
    %15 = vector.shape_cast %14 : vector<16xf32> to vector<16x1xf32>
    %cst_11 = arith.constant 1.000000e-24 : f32
    %16 = vector.broadcast %cst_11 : f32 to vector<16x1xf32>
    %17 = arith.maximumf %15, %16 : vector<16x1xf32>
    %18 = math.rsqrt %17 : vector<16x1xf32>
    %19 = vector.broadcast %18 : vector<16x1xf32> to vector<16x128xf32>
    %20 = arith.mulf %12, %19 : vector<16x128xf32>
    %21 = arith.truncf %20 : vector<16x128xf32> to vector<16x128xbf16>
    %c0_12 = arith.constant 0 : index
    %c0_13 = arith.constant 0 : index
    %c0_14 = arith.constant 0 : index
    %22 = vector.load %arg5[%c0_12, %c0_13, %c0_14] : memref<3x128x128xbf16, #tpu.memory_space<vmem>>, vector<1x128x128xbf16>
    %23 = vector.shape_cast %22 : vector<1x128x128xbf16> to vector<128x128xbf16>
    %cst_15 = arith.constant dense<0.000000e+00> : vector<16x128xf32>
    %24 = tpu.matmul %21, %23, %cst_15 {dimension_numbers = #tpu.dot_dimension_numbers<[1], [0], [0], [1], [0, 0, 1, 1], [], []>} : vector<16x128xbf16>, vector<128x128xbf16>, vector<16x128xf32> -> vector<16x128xf32>
    %c0_16 = arith.constant 0 : index
    %c0_17 = arith.constant 0 : index
    %c0_18 = arith.constant 0 : index
    %25 = vector.load %arg6[%c0_16, %c0_17, %c0_18] : memref<3x1x128xf32, #tpu.memory_space<vmem>>, vector<1x1x128xf32>
    %26 = vector.shape_cast %25 : vector<1x1x128xf32> to vector<1x128xf32>
    %27 = vector.broadcast %26 : vector<1x128xf32> to vector<16x128xf32>
    %28 = arith.addf %24, %27 : vector<16x128xf32>
    %cst_19 = arith.constant 2.000000e-01 : f32
    %29 = vector.broadcast %cst_19 : f32 to vector<16x128xf32>
    %30 = arith.mulf %29, %28 : vector<16x128xf32>
    %31 = arith.maximumf %28, %30 : vector<16x128xf32>
    %cst_20 = arith.constant dense<0.000000e+00> : vector<128xf32>
    %32 = vector.multi_reduction <add>, %31, %cst_20 [0] : vector<16x128xf32> to vector<128xf32>
    %33 = vector.shape_cast %32 : vector<128xf32> to vector<1x128xf32>
    %cst_21 = arith.constant 1.600000e+01 : f32
    %34 = vector.broadcast %cst_21 : f32 to vector<1x128xf32>
    %35 = arith.divf %33, %34 : vector<1x128xf32>
    %36 = vector.broadcast %35 : vector<1x128xf32> to vector<16x128xf32>
    %37 = arith.subf %31, %36 : vector<16x128xf32>
    %38 = arith.mulf %37, %37 : vector<16x128xf32>
    %cst_22 = arith.constant dense<0.000000e+00> : vector<128xf32>
    %39 = vector.multi_reduction <add>, %38, %cst_22 [0] : vector<16x128xf32> to vector<128xf32>
    %40 = vector.shape_cast %39 : vector<128xf32> to vector<1x128xf32>
    %cst_23 = arith.constant 1.600000e+01 : f32
    %41 = vector.broadcast %cst_23 : f32 to vector<1x128xf32>
    %42 = arith.divf %40, %41 : vector<1x128xf32>
    %43 = vector.broadcast %35 : vector<1x128xf32> to vector<16x128xf32>
    %44 = arith.subf %31, %43 : vector<16x128xf32>
    %cst_24 = arith.constant 9.99999974E-6 : f32
    %45 = vector.broadcast %cst_24 : f32 to vector<1x128xf32>
    %46 = arith.addf %42, %45 : vector<1x128xf32>
    %47 = math.rsqrt %46 : vector<1x128xf32>
    %48 = vector.broadcast %47 : vector<1x128xf32> to vector<16x128xf32>
    %49 = arith.mulf %44, %48 : vector<16x128xf32>
    %c0_25 = arith.constant 0 : index
    %c0_26 = arith.constant 0 : index
    %c0_27 = arith.constant 0 : index
    %50 = vector.load %arg7[%c0_25, %c0_26, %c0_27] : memref<3x1x128xf32, #tpu.memory_space<vmem>>, vector<1x1x128xf32>
    %51 = vector.shape_cast %50 : vector<1x1x128xf32> to vector<1x128xf32>
    %52 = vector.broadcast %51 : vector<1x128xf32> to vector<16x128xf32>
    %53 = arith.mulf %49, %52 : vector<16x128xf32>
    %c0_28 = arith.constant 0 : index
    %c0_29 = arith.constant 0 : index
    %c0_30 = arith.constant 0 : index
    %54 = vector.load %arg8[%c0_28, %c0_29, %c0_30] : memref<3x1x128xf32, #tpu.memory_space<vmem>>, vector<1x1x128xf32>
    %55 = vector.shape_cast %54 : vector<1x1x128xf32> to vector<1x128xf32>
    %56 = vector.broadcast %55 : vector<1x128xf32> to vector<16x128xf32>
    %57 = arith.addf %53, %56 : vector<16x128xf32>
    %58 = arith.addf %1, %57 : vector<16x128xf32>
    %59 = arith.truncf %58 : vector<16x128xf32> to vector<16x128xbf16>
    %cst_31 = arith.constant dense<0.000000e+00> : vector<16x128xf32>
    %60 = tpu.matmul %0, %59, %cst_31 {dimension_numbers = #tpu.dot_dimension_numbers<[1], [0], [0], [1], [0, 0, 1, 1], [], []>} : vector<16x16xbf16>, vector<16x128xbf16>, vector<16x128xf32> -> vector<16x128xf32>
    %61 = arith.truncf %60 : vector<16x128xf32> to vector<16x128xbf16>
    %62 = tpu.concatenate %61, %59 in 1 : vector<16x128xbf16>, vector<16x128xbf16> -> vector<16x256xbf16>
    %c0_32 = arith.constant 0 : index
    %c0_33 = arith.constant 0 : index
    %c0_34 = arith.constant 0 : index
    %63 = vector.load %arg3[%c0_32, %c0_33, %c0_34] : memref<3x256x128xbf16, #tpu.memory_space<vmem>>, vector<1x256x128xbf16>
    %64 = vector.shape_cast %63 : vector<1x256x128xbf16> to vector<256x128xbf16>
    %cst_35 = arith.constant dense<0.000000e+00> : vector<16x128xf32>
    %65 = tpu.matmul %62, %64, %cst_35 {dimension_numbers = #tpu.dot_dimension_numbers<[1], [0], [0], [1], [0, 0, 1, 1], [], []>} : vector<16x256xbf16>, vector<256x128xbf16>, vector<16x128xf32> -> vector<16x128xf32>
    %c0_36 = arith.constant 0 : index
    %c0_37 = arith.constant 0 : index
    %c0_38 = arith.constant 0 : index
    %66 = vector.load %arg4[%c0_36, %c0_37, %c0_38] : memref<3x1x128xf32, #tpu.memory_space<vmem>>, vector<1x1x128xf32>
    %67 = vector.shape_cast %66 : vector<1x1x128xf32> to vector<1x128xf32>
    %68 = vector.broadcast %67 : vector<1x128xf32> to vector<16x128xf32>
    %69 = arith.addf %65, %68 : vector<16x128xf32>
    %70 = arith.mulf %69, %69 : vector<16x128xf32>
    %cst_39 = arith.constant dense<0.000000e+00> : vector<16xf32>
    %71 = vector.multi_reduction <add>, %70, %cst_39 [1] : vector<16x128xf32> to vector<16xf32>
    %72 = vector.shape_cast %71 : vector<16xf32> to vector<16x1xf32>
    %cst_40 = arith.constant 1.000000e-24 : f32
    %73 = vector.broadcast %cst_40 : f32 to vector<16x1xf32>
    %74 = arith.maximumf %72, %73 : vector<16x1xf32>
    %75 = math.rsqrt %74 : vector<16x1xf32>
    %76 = vector.broadcast %75 : vector<16x1xf32> to vector<16x128xf32>
    %77 = arith.mulf %69, %76 : vector<16x128xf32>
    %78 = arith.truncf %77 : vector<16x128xf32> to vector<16x128xbf16>
    %c0_41 = arith.constant 0 : index
    %c0_42 = arith.constant 0 : index
    %c0_43 = arith.constant 0 : index
    %79 = vector.load %arg5[%c0_41, %c0_42, %c0_43] : memref<3x128x128xbf16, #tpu.memory_space<vmem>>, vector<1x128x128xbf16>
    %80 = vector.shape_cast %79 : vector<1x128x128xbf16> to vector<128x128xbf16>
    %cst_44 = arith.constant dense<0.000000e+00> : vector<16x128xf32>
    %81 = tpu.matmul %78, %80, %cst_44 {dimension_numbers = #tpu.dot_dimension_numbers<[1], [0], [0], [1], [0, 0, 1, 1], [], []>} : vector<16x128xbf16>, vector<128x128xbf16>, vector<16x128xf32> -> vector<16x128xf32>
    %c0_45 = arith.constant 0 : index
    %c0_46 = arith.constant 0 : index
    %c0_47 = arith.constant 0 : index
    %82 = vector.load %arg6[%c0_45, %c0_46, %c0_47] : memref<3x1x128xf32, #tpu.memory_space<vmem>>, vector<1x1x128xf32>
    %83 = vector.shape_cast %82 : vector<1x1x128xf32> to vector<1x128xf32>
    %84 = vector.broadcast %83 : vector<1x128xf32> to vector<16x128xf32>
    %85 = arith.addf %81, %84 : vector<16x128xf32>
    %cst_48 = arith.constant 2.000000e-01 : f32
    %86 = vector.broadcast %cst_48 : f32 to vector<16x128xf32>
    %87 = arith.mulf %86, %85 : vector<16x128xf32>
    %88 = arith.maximumf %85, %87 : vector<16x128xf32>
    %cst_49 = arith.constant dense<0.000000e+00> : vector<128xf32>
    %89 = vector.multi_reduction <add>, %88, %cst_49 [0] : vector<16x128xf32> to vector<128xf32>
    %90 = vector.shape_cast %89 : vector<128xf32> to vector<1x128xf32>
    %cst_50 = arith.constant 1.600000e+01 : f32
    %91 = vector.broadcast %cst_50 : f32 to vector<1x128xf32>
    %92 = arith.divf %90, %91 : vector<1x128xf32>
    %93 = vector.broadcast %92 : vector<1x128xf32> to vector<16x128xf32>
    %94 = arith.subf %88, %93 : vector<16x128xf32>
    %95 = arith.mulf %94, %94 : vector<16x128xf32>
    %cst_51 = arith.constant dense<0.000000e+00> : vector<128xf32>
    %96 = vector.multi_reduction <add>, %95, %cst_51 [0] : vector<16x128xf32> to vector<128xf32>
    %97 = vector.shape_cast %96 : vector<128xf32> to vector<1x128xf32>
    %cst_52 = arith.constant 1.600000e+01 : f32
    %98 = vector.broadcast %cst_52 : f32 to vector<1x128xf32>
    %99 = arith.divf %97, %98 : vector<1x128xf32>
    %100 = vector.broadcast %92 : vector<1x128xf32> to vector<16x128xf32>
    %101 = arith.subf %88, %100 : vector<16x128xf32>
    %cst_53 = arith.constant 9.99999974E-6 : f32
    %102 = vector.broadcast %cst_53 : f32 to vector<1x128xf32>
    %103 = arith.addf %99, %102 : vector<1x128xf32>
    %104 = math.rsqrt %103 : vector<1x128xf32>
    %105 = vector.broadcast %104 : vector<1x128xf32> to vector<16x128xf32>
    %106 = arith.mulf %101, %105 : vector<16x128xf32>
    %c0_54 = arith.constant 0 : index
    %c0_55 = arith.constant 0 : index
    %c0_56 = arith.constant 0 : index
    %107 = vector.load %arg7[%c0_54, %c0_55, %c0_56] : memref<3x1x128xf32, #tpu.memory_space<vmem>>, vector<1x1x128xf32>
    %108 = vector.shape_cast %107 : vector<1x1x128xf32> to vector<1x128xf32>
    %109 = vector.broadcast %108 : vector<1x128xf32> to vector<16x128xf32>
    %110 = arith.mulf %106, %109 : vector<16x128xf32>
    %c0_57 = arith.constant 0 : index
    %c0_58 = arith.constant 0 : index
    %c0_59 = arith.constant 0 : index
    %111 = vector.load %arg8[%c0_57, %c0_58, %c0_59] : memref<3x1x128xf32, #tpu.memory_space<vmem>>, vector<1x1x128xf32>
    %112 = vector.shape_cast %111 : vector<1x1x128xf32> to vector<1x128xf32>
    %113 = vector.broadcast %112 : vector<1x128xf32> to vector<16x128xf32>
    %114 = arith.addf %110, %113 : vector<16x128xf32>
    %115 = arith.addf %58, %114 : vector<16x128xf32>
    %116 = arith.mulf %115, %115 : vector<16x128xf32>
    %cst_60 = arith.constant dense<0.000000e+00> : vector<16xf32>
    %117 = vector.multi_reduction <add>, %116, %cst_60 [1] : vector<16x128xf32> to vector<16xf32>
    %118 = vector.shape_cast %117 : vector<16xf32> to vector<16x1xf32>
    %cst_61 = arith.constant dense<0.000000e+00> : vector<16x16xf32>
    %119 = tpu.matmul %115, %115, %cst_61 {dimension_numbers = #tpu.dot_dimension_numbers<[1], [1], [0], [0], [0, 0, 1, 0], [], []>} : vector<16x128xf32>, vector<16x128xf32>, vector<16x16xf32> -> vector<16x16xf32>
    %120 = tpu.transpose %118, [1, 0] : vector<16x1xf32> -> vector<1x16xf32>
    %121 = vector.broadcast %118 : vector<16x1xf32> to vector<16x16xf32>
    %122 = vector.broadcast %120 : vector<1x16xf32> to vector<16x16xf32>
    %123 = arith.addf %121, %122 : vector<16x16xf32>
    %cst_62 = arith.constant 2.000000e+00 : f32
    %124 = vector.broadcast %cst_62 : f32 to vector<16x16xf32>
    %125 = arith.mulf %124, %119 : vector<16x16xf32>
    %126 = arith.subf %123, %125 : vector<16x16xf32>
    %c0_63 = arith.constant 0 : index
    %c0_64 = arith.constant 0 : index
    %127 = vector.load %arg1[%c0_63, %c0_64] : memref<1x16xi32, #tpu.memory_space<vmem>>, vector<1x16xi32>
    %128 = arith.sitofp %127 : vector<1x16xi32> to vector<1x16xf32>
    %129 = vector.shape_cast %128 : vector<1x16xf32> to vector<1x16xf32>
    %130 = vector.broadcast %129 : vector<1x16xf32> to vector<16x16xf32>
    %131 = tpu.transpose %130, [1, 0] : vector<16x16xf32> -> vector<16x16xf32>
    %132 = arith.cmpf oeq, %130, %131 : vector<16x16xf32>
    %133 = tpu.iota {dimensions = array<i32: 0>} : vector<16x16xi32>
    %134 = tpu.iota {dimensions = array<i32: 1>} : vector<16x16xi32>
    %135 = arith.cmpi ne, %133, %134 : vector<16x16xi32>
    %136 = arith.andi %132, %135 : vector<16x16xi1>
    %cst_65 = arith.constant 0x7F800000 : f32
    %137 = vector.broadcast %cst_65 : f32 to vector<16x16xf32>
    %138 = arith.select %136, %126, %137 : vector<16x16xi1>, vector<16x16xf32>
    %cst_66 = arith.constant dense<0x7F800000> : vector<16xf32>
    %139 = vector.multi_reduction <minimumf>, %138, %cst_66 [1] : vector<16x16xf32> to vector<16xf32>
    %140 = vector.shape_cast %139 : vector<16xf32> to vector<16x1xf32>
    %141 = arith.sitofp %134 : vector<16x16xi32> to vector<16x16xf32>
    %142 = vector.broadcast %140 : vector<16x1xf32> to vector<16x16xf32>
    %143 = arith.cmpf ole, %138, %142 : vector<16x16xf32>
    %cst_67 = arith.constant 1.600000e+01 : f32
    %144 = vector.broadcast %cst_67 : f32 to vector<16x16xf32>
    %145 = arith.select %143, %141, %144 : vector<16x16xi1>, vector<16x16xf32>
    %cst_68 = arith.constant dense<0x7F800000> : vector<16xf32>
    %146 = vector.multi_reduction <minimumf>, %145, %cst_68 [1] : vector<16x16xf32> to vector<16xf32>
    %147 = vector.shape_cast %146 : vector<16xf32> to vector<16x1xf32>
    %148 = vector.broadcast %147 : vector<16x1xf32> to vector<16x16xf32>
    %149 = arith.cmpf oeq, %141, %148 : vector<16x16xf32>
    %150 = arith.extui %149 : vector<16x16xi1> to vector<16x16xi32>
    %151 = arith.sitofp %150 : vector<16x16xi32> to vector<16x16xf32>
    %152 = tpu.transpose %151, [1, 0] : vector<16x16xf32> -> vector<16x16xf32>
    %153 = arith.truncf %152 : vector<16x16xf32> to vector<16x16xbf16>
    %cst_69 = arith.constant dense<0.000000e+00> : vector<16x128xf32>
    %154 = tpu.matmul %151, %115, %cst_69 {dimension_numbers = #tpu.dot_dimension_numbers<[1], [0], [0], [1], [0, 0, 1, 1], [], []>} : vector<16x16xf32>, vector<16x128xf32>, vector<16x128xf32> -> vector<16x128xf32>
    %cst_70 = arith.constant dense<0.000000e+00> : vector<16x128xf32>
    %155 = tpu.matmul %151, %154, %cst_70 {dimension_numbers = #tpu.dot_dimension_numbers<[1], [0], [0], [1], [0, 0, 1, 1], [], []>} : vector<16x16xf32>, vector<16x128xf32>, vector<16x128xf32> -> vector<16x128xf32>
    %156 = arith.addf %154, %155 : vector<16x128xf32>
    %157 = arith.truncf %156 : vector<16x128xf32> to vector<16x128xbf16>
    %cst_71 = arith.constant dense<0.000000e+00> : vector<16x128xf32>
    %158 = tpu.matmul %153, %157, %cst_71 {dimension_numbers = #tpu.dot_dimension_numbers<[1], [0], [0], [1], [0, 0, 1, 1], [], []>} : vector<16x16xbf16>, vector<16x128xbf16>, vector<16x128xf32> -> vector<16x128xf32>
    %159 = arith.truncf %158 : vector<16x128xf32> to vector<16x128xbf16>
    %160 = tpu.concatenate %159, %157 in 1 : vector<16x128xbf16>, vector<16x128xbf16> -> vector<16x256xbf16>
    %c1 = arith.constant 1 : index
    %c0_72 = arith.constant 0 : index
    %c0_73 = arith.constant 0 : index
    %161 = vector.load %arg3[%c1, %c0_72, %c0_73] : memref<3x256x128xbf16, #tpu.memory_space<vmem>>, vector<1x256x128xbf16>
    %162 = vector.shape_cast %161 : vector<1x256x128xbf16> to vector<256x128xbf16>
    %cst_74 = arith.constant dense<0.000000e+00> : vector<16x128xf32>
    %163 = tpu.matmul %160, %162, %cst_74 {dimension_numbers = #tpu.dot_dimension_numbers<[1], [0], [0], [1], [0, 0, 1, 1], [], []>} : vector<16x256xbf16>, vector<256x128xbf16>, vector<16x128xf32> -> vector<16x128xf32>
    %c1_75 = arith.constant 1 : index
    %c0_76 = arith.constant 0 : index
    %c0_77 = arith.constant 0 : index
    %164 = vector.load %arg4[%c1_75, %c0_76, %c0_77] : memref<3x1x128xf32, #tpu.memory_space<vmem>>, vector<1x1x128xf32>
    %165 = vector.shape_cast %164 : vector<1x1x128xf32> to vector<1x128xf32>
    %166 = vector.broadcast %165 : vector<1x128xf32> to vector<16x128xf32>
    %167 = arith.addf %163, %166 : vector<16x128xf32>
    %168 = arith.mulf %167, %167 : vector<16x128xf32>
    %cst_78 = arith.constant dense<0.000000e+00> : vector<16xf32>
    %169 = vector.multi_reduction <add>, %168, %cst_78 [1] : vector<16x128xf32> to vector<16xf32>
    %170 = vector.shape_cast %169 : vector<16xf32> to vector<16x1xf32>
    %cst_79 = arith.constant 1.000000e-24 : f32
    %171 = vector.broadcast %cst_79 : f32 to vector<16x1xf32>
    %172 = arith.maximumf %170, %171 : vector<16x1xf32>
    %173 = math.rsqrt %172 : vector<16x1xf32>
    %174 = vector.broadcast %173 : vector<16x1xf32> to vector<16x128xf32>
    %175 = arith.mulf %167, %174 : vector<16x128xf32>
    %176 = arith.truncf %175 : vector<16x128xf32> to vector<16x128xbf16>
    %c1_80 = arith.constant 1 : index
    %c0_81 = arith.constant 0 : index
    %c0_82 = arith.constant 0 : index
    %177 = vector.load %arg5[%c1_80, %c0_81, %c0_82] : memref<3x128x128xbf16, #tpu.memory_space<vmem>>, vector<1x128x128xbf16>
    %178 = vector.shape_cast %177 : vector<1x128x128xbf16> to vector<128x128xbf16>
    %cst_83 = arith.constant dense<0.000000e+00> : vector<16x128xf32>
    %179 = tpu.matmul %176, %178, %cst_83 {dimension_numbers = #tpu.dot_dimension_numbers<[1], [0], [0], [1], [0, 0, 1, 1], [], []>} : vector<16x128xbf16>, vector<128x128xbf16>, vector<16x128xf32> -> vector<16x128xf32>
    %c1_84 = arith.constant 1 : index
    %c0_85 = arith.constant 0 : index
    %c0_86 = arith.constant 0 : index
    %180 = vector.load %arg6[%c1_84, %c0_85, %c0_86] : memref<3x1x128xf32, #tpu.memory_space<vmem>>, vector<1x1x128xf32>
    %181 = vector.shape_cast %180 : vector<1x1x128xf32> to vector<1x128xf32>
    %182 = vector.broadcast %181 : vector<1x128xf32> to vector<16x128xf32>
    %183 = arith.addf %179, %182 : vector<16x128xf32>
    %cst_87 = arith.constant 2.000000e-01 : f32
    %184 = vector.broadcast %cst_87 : f32 to vector<16x128xf32>
    %185 = arith.mulf %184, %183 : vector<16x128xf32>
    %186 = arith.maximumf %183, %185 : vector<16x128xf32>
    %cst_88 = arith.constant dense<0.000000e+00> : vector<128xf32>
    %187 = vector.multi_reduction <add>, %186, %cst_88 [0] : vector<16x128xf32> to vector<128xf32>
    %188 = vector.shape_cast %187 : vector<128xf32> to vector<1x128xf32>
    %cst_89 = arith.constant 1.600000e+01 : f32
    %189 = vector.broadcast %cst_89 : f32 to vector<1x128xf32>
    %190 = arith.divf %188, %189 : vector<1x128xf32>
    %191 = vector.broadcast %190 : vector<1x128xf32> to vector<16x128xf32>
    %192 = arith.subf %186, %191 : vector<16x128xf32>
    %193 = arith.mulf %192, %192 : vector<16x128xf32>
    %cst_90 = arith.constant dense<0.000000e+00> : vector<128xf32>
    %194 = vector.multi_reduction <add>, %193, %cst_90 [0] : vector<16x128xf32> to vector<128xf32>
    %195 = vector.shape_cast %194 : vector<128xf32> to vector<1x128xf32>
    %cst_91 = arith.constant 1.600000e+01 : f32
    %196 = vector.broadcast %cst_91 : f32 to vector<1x128xf32>
    %197 = arith.divf %195, %196 : vector<1x128xf32>
    %198 = vector.broadcast %190 : vector<1x128xf32> to vector<16x128xf32>
    %199 = arith.subf %186, %198 : vector<16x128xf32>
    %cst_92 = arith.constant 9.99999974E-6 : f32
    %200 = vector.broadcast %cst_92 : f32 to vector<1x128xf32>
    %201 = arith.addf %197, %200 : vector<1x128xf32>
    %202 = math.rsqrt %201 : vector<1x128xf32>
    %203 = vector.broadcast %202 : vector<1x128xf32> to vector<16x128xf32>
    %204 = arith.mulf %199, %203 : vector<16x128xf32>
    %c1_93 = arith.constant 1 : index
    %c0_94 = arith.constant 0 : index
    %c0_95 = arith.constant 0 : index
    %205 = vector.load %arg7[%c1_93, %c0_94, %c0_95] : memref<3x1x128xf32, #tpu.memory_space<vmem>>, vector<1x1x128xf32>
    %206 = vector.shape_cast %205 : vector<1x1x128xf32> to vector<1x128xf32>
    %207 = vector.broadcast %206 : vector<1x128xf32> to vector<16x128xf32>
    %208 = arith.mulf %204, %207 : vector<16x128xf32>
    %c1_96 = arith.constant 1 : index
    %c0_97 = arith.constant 0 : index
    %c0_98 = arith.constant 0 : index
    %209 = vector.load %arg8[%c1_96, %c0_97, %c0_98] : memref<3x1x128xf32, #tpu.memory_space<vmem>>, vector<1x1x128xf32>
    %210 = vector.shape_cast %209 : vector<1x1x128xf32> to vector<1x128xf32>
    %211 = vector.broadcast %210 : vector<1x128xf32> to vector<16x128xf32>
    %212 = arith.addf %208, %211 : vector<16x128xf32>
    %213 = arith.truncf %212 : vector<16x128xf32> to vector<16x128xbf16>
    %cst_99 = arith.constant dense<0.000000e+00> : vector<16x128xf32>
    %214 = tpu.matmul %153, %213, %cst_99 {dimension_numbers = #tpu.dot_dimension_numbers<[1], [0], [0], [1], [0, 0, 1, 1], [], []>} : vector<16x16xbf16>, vector<16x128xbf16>, vector<16x128xf32> -> vector<16x128xf32>
    %215 = arith.truncf %214 : vector<16x128xf32> to vector<16x128xbf16>
    %216 = tpu.concatenate %215, %213 in 1 : vector<16x128xbf16>, vector<16x128xbf16> -> vector<16x256xbf16>
    %c2 = arith.constant 2 : index
    %c0_100 = arith.constant 0 : index
    %c0_101 = arith.constant 0 : index
    %217 = vector.load %arg3[%c2, %c0_100, %c0_101] : memref<3x256x128xbf16, #tpu.memory_space<vmem>>, vector<1x256x128xbf16>
    %218 = vector.shape_cast %217 : vector<1x256x128xbf16> to vector<256x128xbf16>
    %cst_102 = arith.constant dense<0.000000e+00> : vector<16x128xf32>
    %219 = tpu.matmul %216, %218, %cst_102 {dimension_numbers = #tpu.dot_dimension_numbers<[1], [0], [0], [1], [0, 0, 1, 1], [], []>} : vector<16x256xbf16>, vector<256x128xbf16>, vector<16x128xf32> -> vector<16x128xf32>
    %c2_103 = arith.constant 2 : index
    %c0_104 = arith.constant 0 : index
    %c0_105 = arith.constant 0 : index
    %220 = vector.load %arg4[%c2_103, %c0_104, %c0_105] : memref<3x1x128xf32, #tpu.memory_space<vmem>>, vector<1x1x128xf32>
    %221 = vector.shape_cast %220 : vector<1x1x128xf32> to vector<1x128xf32>
    %222 = vector.broadcast %221 : vector<1x128xf32> to vector<16x128xf32>
    %223 = arith.addf %219, %222 : vector<16x128xf32>
    %224 = arith.mulf %223, %223 : vector<16x128xf32>
    %cst_106 = arith.constant dense<0.000000e+00> : vector<16xf32>
    %225 = vector.multi_reduction <add>, %224, %cst_106 [1] : vector<16x128xf32> to vector<16xf32>
    %226 = vector.shape_cast %225 : vector<16xf32> to vector<16x1xf32>
    %cst_107 = arith.constant 1.000000e-24 : f32
    %227 = vector.broadcast %cst_107 : f32 to vector<16x1xf32>
    %228 = arith.maximumf %226, %227 : vector<16x1xf32>
    %229 = math.rsqrt %228 : vector<16x1xf32>
    %230 = vector.broadcast %229 : vector<16x1xf32> to vector<16x128xf32>
    %231 = arith.mulf %223, %230 : vector<16x128xf32>
    %232 = arith.truncf %231 : vector<16x128xf32> to vector<16x128xbf16>
    %c2_108 = arith.constant 2 : index
    %c0_109 = arith.constant 0 : index
    %c0_110 = arith.constant 0 : index
    %233 = vector.load %arg5[%c2_108, %c0_109, %c0_110] : memref<3x128x128xbf16, #tpu.memory_space<vmem>>, vector<1x128x128xbf16>
    %234 = vector.shape_cast %233 : vector<1x128x128xbf16> to vector<128x128xbf16>
    %cst_111 = arith.constant dense<0.000000e+00> : vector<16x128xf32>
    %235 = tpu.matmul %232, %234, %cst_111 {dimension_numbers = #tpu.dot_dimension_numbers<[1], [0], [0], [1], [0, 0, 1, 1], [], []>} : vector<16x128xbf16>, vector<128x128xbf16>, vector<16x128xf32> -> vector<16x128xf32>
    %c2_112 = arith.constant 2 : index
    %c0_113 = arith.constant 0 : index
    %c0_114 = arith.constant 0 : index
    %236 = vector.load %arg6[%c2_112, %c0_113, %c0_114] : memref<3x1x128xf32, #tpu.memory_space<vmem>>, vector<1x1x128xf32>
    %237 = vector.shape_cast %236 : vector<1x1x128xf32> to vector<1x128xf32>
    %238 = vector.broadcast %237 : vector<1x128xf32> to vector<16x128xf32>
    %239 = arith.addf %235, %238 : vector<16x128xf32>
    %cst_115 = arith.constant 2.000000e-01 : f32
    %240 = vector.broadcast %cst_115 : f32 to vector<16x128xf32>
    %241 = arith.mulf %240, %239 : vector<16x128xf32>
    %242 = arith.maximumf %239, %241 : vector<16x128xf32>
    %cst_116 = arith.constant dense<0.000000e+00> : vector<128xf32>
    %243 = vector.multi_reduction <add>, %242, %cst_116 [0] : vector<16x128xf32> to vector<128xf32>
    %244 = vector.shape_cast %243 : vector<128xf32> to vector<1x128xf32>
    %cst_117 = arith.constant 1.600000e+01 : f32
    %245 = vector.broadcast %cst_117 : f32 to vector<1x128xf32>
    %246 = arith.divf %244, %245 : vector<1x128xf32>
    %247 = vector.broadcast %246 : vector<1x128xf32> to vector<16x128xf32>
    %248 = arith.subf %242, %247 : vector<16x128xf32>
    %249 = arith.mulf %248, %248 : vector<16x128xf32>
    %cst_118 = arith.constant dense<0.000000e+00> : vector<128xf32>
    %250 = vector.multi_reduction <add>, %249, %cst_118 [0] : vector<16x128xf32> to vector<128xf32>
    %251 = vector.shape_cast %250 : vector<128xf32> to vector<1x128xf32>
    %cst_119 = arith.constant 1.600000e+01 : f32
    %252 = vector.broadcast %cst_119 : f32 to vector<1x128xf32>
    %253 = arith.divf %251, %252 : vector<1x128xf32>
    %254 = vector.broadcast %246 : vector<1x128xf32> to vector<16x128xf32>
    %255 = arith.subf %242, %254 : vector<16x128xf32>
    %cst_120 = arith.constant 9.99999974E-6 : f32
    %256 = vector.broadcast %cst_120 : f32 to vector<1x128xf32>
    %257 = arith.addf %253, %256 : vector<1x128xf32>
    %258 = math.rsqrt %257 : vector<1x128xf32>
    %259 = vector.broadcast %258 : vector<1x128xf32> to vector<16x128xf32>
    %260 = arith.mulf %255, %259 : vector<16x128xf32>
    %c2_121 = arith.constant 2 : index
    %c0_122 = arith.constant 0 : index
    %c0_123 = arith.constant 0 : index
    %261 = vector.load %arg7[%c2_121, %c0_122, %c0_123] : memref<3x1x128xf32, #tpu.memory_space<vmem>>, vector<1x1x128xf32>
    %262 = vector.shape_cast %261 : vector<1x1x128xf32> to vector<1x128xf32>
    %263 = vector.broadcast %262 : vector<1x128xf32> to vector<16x128xf32>
    %264 = arith.mulf %260, %263 : vector<16x128xf32>
    %c2_124 = arith.constant 2 : index
    %c0_125 = arith.constant 0 : index
    %c0_126 = arith.constant 0 : index
    %265 = vector.load %arg8[%c2_124, %c0_125, %c0_126] : memref<3x1x128xf32, #tpu.memory_space<vmem>>, vector<1x1x128xf32>
    %266 = vector.shape_cast %265 : vector<1x1x128xf32> to vector<1x128xf32>
    %267 = vector.broadcast %266 : vector<1x128xf32> to vector<16x128xf32>
    %268 = arith.addf %264, %267 : vector<16x128xf32>
    %269 = vector.shape_cast %268 : vector<16x128xf32> to vector<2x8x128xf32>
    %cst_127 = arith.constant 0.000000e+00 : f32
    %270 = vector.broadcast %cst_127 : f32 to vector<2x128xf32>
    %271 = vector.extract_strided_slice %269 {offsets = [0, 0, 0], sizes = [2, 1, 128], strides = [1, 1, 1]} : vector<2x8x128xf32> to vector<2x1x128xf32>
    %272 = vector.shape_cast %271 : vector<2x1x128xf32> to vector<2x128xf32>
    %273 = arith.truncf %272 : vector<2x128xf32> to vector<2x128xbf16>
    %c0_128 = arith.constant 0 : index
    %c0_129 = arith.constant 0 : index
    %c0_130 = arith.constant 0 : index
    %274 = vector.load %arg9[%c0_128, %c0_129, %c0_130] : memref<8x128x128xbf16, #tpu.memory_space<vmem>>, vector<1x128x128xbf16>
    %275 = vector.shape_cast %274 : vector<1x128x128xbf16> to vector<128x128xbf16>
    %cst_131 = arith.constant dense<0.000000e+00> : vector<2x128xf32>
    %276 = tpu.matmul %273, %275, %cst_131 {dimension_numbers = #tpu.dot_dimension_numbers<[1], [0], [0], [1], [0, 0, 1, 1], [], []>} : vector<2x128xbf16>, vector<128x128xbf16>, vector<2x128xf32> -> vector<2x128xf32>
    %277 = arith.addf %270, %276 : vector<2x128xf32>
    %278 = vector.extract_strided_slice %269 {offsets = [0, 1, 0], sizes = [2, 1, 128], strides = [1, 1, 1]} : vector<2x8x128xf32> to vector<2x1x128xf32>
    %279 = vector.shape_cast %278 : vector<2x1x128xf32> to vector<2x128xf32>
    %280 = arith.truncf %279 : vector<2x128xf32> to vector<2x128xbf16>
    %c1_132 = arith.constant 1 : index
    %c0_133 = arith.constant 0 : index
    %c0_134 = arith.constant 0 : index
    %281 = vector.load %arg9[%c1_132, %c0_133, %c0_134] : memref<8x128x128xbf16, #tpu.memory_space<vmem>>, vector<1x128x128xbf16>
    %282 = vector.shape_cast %281 : vector<1x128x128xbf16> to vector<128x128xbf16>
    %cst_135 = arith.constant dense<0.000000e+00> : vector<2x128xf32>
    %283 = tpu.matmul %280, %282, %cst_135 {dimension_numbers = #tpu.dot_dimension_numbers<[1], [0], [0], [1], [0, 0, 1, 1], [], []>} : vector<2x128xbf16>, vector<128x128xbf16>, vector<2x128xf32> -> vector<2x128xf32>
    %284 = arith.addf %277, %283 : vector<2x128xf32>
    %285 = vector.extract_strided_slice %269 {offsets = [0, 2, 0], sizes = [2, 1, 128], strides = [1, 1, 1]} : vector<2x8x128xf32> to vector<2x1x128xf32>
    %286 = vector.shape_cast %285 : vector<2x1x128xf32> to vector<2x128xf32>
    %287 = arith.truncf %286 : vector<2x128xf32> to vector<2x128xbf16>
    %c2_136 = arith.constant 2 : index
    %c0_137 = arith.constant 0 : index
    %c0_138 = arith.constant 0 : index
    %288 = vector.load %arg9[%c2_136, %c0_137, %c0_138] : memref<8x128x128xbf16, #tpu.memory_space<vmem>>, vector<1x128x128xbf16>
    %289 = vector.shape_cast %288 : vector<1x128x128xbf16> to vector<128x128xbf16>
    %cst_139 = arith.constant dense<0.000000e+00> : vector<2x128xf32>
    %290 = tpu.matmul %287, %289, %cst_139 {dimension_numbers = #tpu.dot_dimension_numbers<[1], [0], [0], [1], [0, 0, 1, 1], [], []>} : vector<2x128xbf16>, vector<128x128xbf16>, vector<2x128xf32> -> vector<2x128xf32>
    %291 = arith.addf %284, %290 : vector<2x128xf32>
    %292 = vector.extract_strided_slice %269 {offsets = [0, 3, 0], sizes = [2, 1, 128], strides = [1, 1, 1]} : vector<2x8x128xf32> to vector<2x1x128xf32>
    %293 = vector.shape_cast %292 : vector<2x1x128xf32> to vector<2x128xf32>
    %294 = arith.truncf %293 : vector<2x128xf32> to vector<2x128xbf16>
    %c3 = arith.constant 3 : index
    %c0_140 = arith.constant 0 : index
    %c0_141 = arith.constant 0 : index
    %295 = vector.load %arg9[%c3, %c0_140, %c0_141] : memref<8x128x128xbf16, #tpu.memory_space<vmem>>, vector<1x128x128xbf16>
    %296 = vector.shape_cast %295 : vector<1x128x128xbf16> to vector<128x128xbf16>
    %cst_142 = arith.constant dense<0.000000e+00> : vector<2x128xf32>
    %297 = tpu.matmul %294, %296, %cst_142 {dimension_numbers = #tpu.dot_dimension_numbers<[1], [0], [0], [1], [0, 0, 1, 1], [], []>} : vector<2x128xbf16>, vector<128x128xbf16>, vector<2x128xf32> -> vector<2x128xf32>
    %298 = arith.addf %291, %297 : vector<2x128xf32>
    %299 = vector.extract_strided_slice %269 {offsets = [0, 4, 0], sizes = [2, 1, 128], strides = [1, 1, 1]} : vector<2x8x128xf32> to vector<2x1x128xf32>
    %300 = vector.shape_cast %299 : vector<2x1x128xf32> to vector<2x128xf32>
    %301 = arith.truncf %300 : vector<2x128xf32> to vector<2x128xbf16>
    %c4 = arith.constant 4 : index
    %c0_143 = arith.constant 0 : index
    %c0_144 = arith.constant 0 : index
    %302 = vector.load %arg9[%c4, %c0_143, %c0_144] : memref<8x128x128xbf16, #tpu.memory_space<vmem>>, vector<1x128x128xbf16>
    %303 = vector.shape_cast %302 : vector<1x128x128xbf16> to vector<128x128xbf16>
    %cst_145 = arith.constant dense<0.000000e+00> : vector<2x128xf32>
    %304 = tpu.matmul %301, %303, %cst_145 {dimension_numbers = #tpu.dot_dimension_numbers<[1], [0], [0], [1], [0, 0, 1, 1], [], []>} : vector<2x128xbf16>, vector<128x128xbf16>, vector<2x128xf32> -> vector<2x128xf32>
    %305 = arith.addf %298, %304 : vector<2x128xf32>
    %306 = vector.extract_strided_slice %269 {offsets = [0, 5, 0], sizes = [2, 1, 128], strides = [1, 1, 1]} : vector<2x8x128xf32> to vector<2x1x128xf32>
    %307 = vector.shape_cast %306 : vector<2x1x128xf32> to vector<2x128xf32>
    %308 = arith.truncf %307 : vector<2x128xf32> to vector<2x128xbf16>
    %c5 = arith.constant 5 : index
    %c0_146 = arith.constant 0 : index
    %c0_147 = arith.constant 0 : index
    %309 = vector.load %arg9[%c5, %c0_146, %c0_147] : memref<8x128x128xbf16, #tpu.memory_space<vmem>>, vector<1x128x128xbf16>
    %310 = vector.shape_cast %309 : vector<1x128x128xbf16> to vector<128x128xbf16>
    %cst_148 = arith.constant dense<0.000000e+00> : vector<2x128xf32>
    %311 = tpu.matmul %308, %310, %cst_148 {dimension_numbers = #tpu.dot_dimension_numbers<[1], [0], [0], [1], [0, 0, 1, 1], [], []>} : vector<2x128xbf16>, vector<128x128xbf16>, vector<2x128xf32> -> vector<2x128xf32>
    %312 = arith.addf %305, %311 : vector<2x128xf32>
    %313 = vector.extract_strided_slice %269 {offsets = [0, 6, 0], sizes = [2, 1, 128], strides = [1, 1, 1]} : vector<2x8x128xf32> to vector<2x1x128xf32>
    %314 = vector.shape_cast %313 : vector<2x1x128xf32> to vector<2x128xf32>
    %315 = arith.truncf %314 : vector<2x128xf32> to vector<2x128xbf16>
    %c6 = arith.constant 6 : index
    %c0_149 = arith.constant 0 : index
    %c0_150 = arith.constant 0 : index
    %316 = vector.load %arg9[%c6, %c0_149, %c0_150] : memref<8x128x128xbf16, #tpu.memory_space<vmem>>, vector<1x128x128xbf16>
    %317 = vector.shape_cast %316 : vector<1x128x128xbf16> to vector<128x128xbf16>
    %cst_151 = arith.constant dense<0.000000e+00> : vector<2x128xf32>
    %318 = tpu.matmul %315, %317, %cst_151 {dimension_numbers = #tpu.dot_dimension_numbers<[1], [0], [0], [1], [0, 0, 1, 1], [], []>} : vector<2x128xbf16>, vector<128x128xbf16>, vector<2x128xf32> -> vector<2x128xf32>
    %319 = arith.addf %312, %318 : vector<2x128xf32>
    %320 = vector.extract_strided_slice %269 {offsets = [0, 7, 0], sizes = [2, 1, 128], strides = [1, 1, 1]} : vector<2x8x128xf32> to vector<2x1x128xf32>
    %321 = vector.shape_cast %320 : vector<2x1x128xf32> to vector<2x128xf32>
    %322 = arith.truncf %321 : vector<2x128xf32> to vector<2x128xbf16>
    %c7 = arith.constant 7 : index
    %c0_152 = arith.constant 0 : index
    %c0_153 = arith.constant 0 : index
    %323 = vector.load %arg9[%c7, %c0_152, %c0_153] : memref<8x128x128xbf16, #tpu.memory_space<vmem>>, vector<1x128x128xbf16>
    %324 = vector.shape_cast %323 : vector<1x128x128xbf16> to vector<128x128xbf16>
    %cst_154 = arith.constant dense<0.000000e+00> : vector<2x128xf32>
    %325 = tpu.matmul %322, %324, %cst_154 {dimension_numbers = #tpu.dot_dimension_numbers<[1], [0], [0], [1], [0, 0, 1, 1], [], []>} : vector<2x128xbf16>, vector<128x128xbf16>, vector<2x128xf32> -> vector<2x128xf32>
    %326 = arith.addf %319, %325 : vector<2x128xf32>
    %c0_155 = arith.constant 0 : index
    %c0_156 = arith.constant 0 : index
    %327 = vector.load %arg10[%c0_155, %c0_156] : memref<1x128xf32, #tpu.memory_space<vmem>>, vector<1x128xf32>
    %328 = vector.broadcast %327 : vector<1x128xf32> to vector<2x128xf32>
    %329 = arith.addf %326, %328 : vector<2x128xf32>
    %cst_157 = arith.constant 2.000000e-01 : f32
    %330 = vector.broadcast %cst_157 : f32 to vector<2x128xf32>
    %331 = arith.mulf %330, %329 : vector<2x128xf32>
    %332 = arith.maximumf %329, %331 : vector<2x128xf32>
    %333 = arith.truncf %332 : vector<2x128xf32> to vector<2x128xbf16>
    %c0_158 = arith.constant 0 : index
    %c0_159 = arith.constant 0 : index
    %334 = vector.load %arg11[%c0_158, %c0_159] : memref<128x128xbf16, #tpu.memory_space<vmem>>, vector<128x128xbf16>
    %cst_160 = arith.constant dense<0.000000e+00> : vector<2x128xf32>
    %335 = tpu.matmul %333, %334, %cst_160 {dimension_numbers = #tpu.dot_dimension_numbers<[1], [0], [0], [1], [0, 0, 1, 1], [], []>} : vector<2x128xbf16>, vector<128x128xbf16>, vector<2x128xf32> -> vector<2x128xf32>
    %c0_161 = arith.constant 0 : index
    %c0_162 = arith.constant 0 : index
    %336 = vector.load %arg12[%c0_161, %c0_162] : memref<1x128xf32, #tpu.memory_space<vmem>>, vector<1x128xf32>
    %337 = vector.broadcast %336 : vector<1x128xf32> to vector<2x128xf32>
    %338 = arith.addf %335, %337 : vector<2x128xf32>
    %cst_163 = arith.constant 2.000000e-01 : f32
    %339 = vector.broadcast %cst_163 : f32 to vector<2x128xf32>
    %340 = arith.mulf %339, %338 : vector<2x128xf32>
    %341 = arith.maximumf %338, %340 : vector<2x128xf32>
    %c0_164 = arith.constant 0 : index
    %c0_165 = arith.constant 0 : index
    %342 = vector.load %arg15[%c0_164, %c0_165] : memref<2x128xf32, #tpu.memory_space<vmem>>, vector<2x128xf32>
    tpu.vector_store %arg15[%c0_164, %c0_165], %341 {strides = array<i32>} : memref<2x128xf32, #tpu.memory_space<vmem>>, vector<2x128xf32>,
    %343 = arith.truncf %341 : vector<2x128xf32> to vector<2x128xbf16>
    %c0_166 = arith.constant 0 : index
    %c0_167 = arith.constant 0 : index
    %344 = vector.load %arg13[%c0_166, %c0_167] : memref<128x128xbf16, #tpu.memory_space<vmem>>, vector<128x128xbf16>
    %cst_168 = arith.constant dense<0.000000e+00> : vector<2x128xf32>
    %345 = tpu.matmul %343, %344, %cst_168 {dimension_numbers = #tpu.dot_dimension_numbers<[1], [0], [0], [1], [0, 0, 1, 1], [], []>} : vector<2x128xbf16>, vector<128x128xbf16>, vector<2x128xf32> -> vector<2x128xf32>
    %c0_169 = arith.constant 0 : index
    %c0_170 = arith.constant 0 : index
    %346 = vector.load %arg14[%c0_169, %c0_170] : memref<1x128xf32, #tpu.memory_space<vmem>>, vector<1x128xf32>
    %347 = vector.broadcast %346 : vector<1x128xf32> to vector<2x128xf32>
    %348 = arith.addf %345, %347 : vector<2x128xf32>
    %349 = tpu.iota {dimensions = array<i32: 1>} : vector<2x128xi32>
    %c2_i32 = arith.constant 2 : i32
    %350 = vector.broadcast %c2_i32 : i32 to vector<2x128xi32>
    %351 = arith.cmpi slt, %349, %350 : vector<2x128xi32>
    %cst_171 = arith.constant -1.000000e+30 : f32
    %352 = vector.broadcast %cst_171 : f32 to vector<2x128xf32>
    %353 = arith.select %351, %348, %352 : vector<2x128xi1>, vector<2x128xf32>
    %cst_172 = arith.constant dense<0xFF800000> : vector<2xf32>
    %354 = vector.multi_reduction <maximumf>, %353, %cst_172 [1] : vector<2x128xf32> to vector<2xf32>
    %355 = vector.shape_cast %354 : vector<2xf32> to vector<2x1xf32>
    %356 = vector.broadcast %355 : vector<2x1xf32> to vector<2x128xf32>
    %357 = arith.subf %353, %356 : vector<2x128xf32>
    %358 = math.exp %357 : vector<2x128xf32>
    %cst_173 = arith.constant dense<0.000000e+00> : vector<2xf32>
    %359 = vector.multi_reduction <add>, %358, %cst_173 [1] : vector<2x128xf32> to vector<2xf32>
    %360 = vector.shape_cast %359 : vector<2xf32> to vector<2x1xf32>
    %361 = vector.broadcast %360 : vector<2x1xf32> to vector<2x128xf32>
    %362 = arith.divf %358, %361 : vector<2x128xf32>
    %c0_174 = arith.constant 0 : index
    %c0_175 = arith.constant 0 : index
    %363 = vector.load %arg16[%c0_174, %c0_175] : memref<2x128xf32, #tpu.memory_space<vmem>>, vector<2x128xf32>
    tpu.vector_store %arg16[%c0_174, %c0_175], %362 {strides = array<i32>} : memref<2x128xf32, #tpu.memory_space<vmem>>, vector<2x128xf32>,
    return
  }
}

</mosaic_0001>

<bundles_post_ra>
// kernel: tpu_custom_call.1
= control target key start
LH: loop header
LB: loop body
LE: loop exit
PB: predicated region body
PF: predicated region fallthrough
CT: control target
= control target key end

     0   :  { %s4810_s0 = inlined_call_operand.hbm [shape: bf16[16,16], index: 0, kind: input, shape index: {}]   ;;  %s4811_s1 = inlined_call_operand.hbm [shape: s32[1,16], index: 1, kind: input, shape index: {}]   ;;  %s4812_s2 = inlined_call_operand.hbm [shape: f32[16,128], index: 2, kind: input, shape index: {}]   ;;  %s4813_s3 = inlined_call_operand.hbm [shape: bf16[3,256,128], index: 3, kind: input, shape index: {}]   ;;  %s4814_s4 = inlined_call_operand.vmem [shape: f32[3,1,128], index: 4, kind: input, shape index: {}]   ;;  %s4815_s5 = inlined_call_operand.hbm [shape: bf16[3,128,128], index: 5, kind: input, shape index: {}]   ;;  %s4816_s6 = inlined_call_operand.vmem [shape: f32[3,1,128], index: 6, kind: input, shape index: {}]   ;;  %s4817_s7 = inlined_call_operand.vmem [shape: f32[3,1,128], index: 7, kind: input, shape index: {}]   ;;  %s4818_s8 = inlined_call_operand.vmem [shape: f32[3,1,128], index: 8, kind: input, shape index: {}]   ;;  %s4819_s9 = inlined_call_operand.hbm [shape: bf16[8,128,128], index: 9, kind: input, shape index: {}]   ;;  %s4820_s10 = inlined_call_operand.vmem [shape: f32[1,128], index: 10, kind: input, shape index: {}]   ;;  %s4821_s11 = inlined_call_operand.hbm [shape: bf16[128,128], index: 11, kind: input, shape index: {}]   ;;  %s4822_s12 = inlined_call_operand.vmem [shape: f32[1,128], index: 12, kind: input, shape index: {}]   ;;  %s4823_s13 = inlined_call_operand.hbm [shape: bf16[128,128], index: 13, kind: input, shape index: {}]   ;;  %s4824_s14 = inlined_call_operand.vmem [shape: f32[1,128], index: 14, kind: input, shape index: {}]   ;;  %s4825_s15 = inlined_call_operand.hbm [shape: f32[2,128], index: 15, kind: output, shape index: {0}]   ;;  %s4826_s16 = inlined_call_operand.hbm [shape: f32[2,128], index: 16, kind: output, shape index: {1}]  }
   0x1   :  { %4827 = sst [smem:[#allocation26_spill]] %s4810_s0 }
   0x2   :  { %22 = vsyncpa [#allocation3], 0 }
   0x3   :  { %23 = vsyncpa [#allocation6], 0 }
   0x4   :  { %24 = vsyncpa [#allocation9], 0 }
   0x5   :  { %25 = vsyncpa [#allocation12], 0 }
   0x6   :  { %26 = vsyncpa [#allocation15], 0 }
   0x7   :  { %27 = vsyncpa [#allocation4], 0 }
   0x8   :  { %28 = vsyncpa [#allocation18], 0  ;;  %s4256_s21 = smov [#allocation5]  }
   0x9   :  { %s47_s22 = sshll.u32 %s4256_s21, 4  ;;  %s48_s22 = int_to_ptr.vmem [resolvable:$true] %s47_s22 }
   0xa   :  { %s4050_s23 = scalar_lea.vmem %s48_s22, 16  ;;  %s4054_s24 = scalar_lea.vmem %s48_s22, 32 }
   0xb   :  { %p4051_p0 = scmp.ne.s32.totalorder %s48_s22, %s4050_s23  ;;  %p4055_p1 = scmp.lt.s32.totalorder %s48_s22, %s48_s22 }
   0xc   :  { %p4056_p2 = scmp.lt.s32.totalorder %s4054_s24, %s4050_s23 }
   0xe   :  { %p4057_p3 = por %p4056_p2, %p4055_p1 }
  0x10   :  { %p4058_p4 = pnand %p4057_p3, %p4051_p0 }
  0x12   :  { %4061 = shalt.err (!%p4058_p4)
}
  0x13   :  { %50 = dma.hbm_to_vmem [thread:$0]  %s4811_s1, 16, %s48_s22, [#allocation6]  }
  0x14   :  { %s4257_s27 = smov [#allocation8]   ;;  %s4258_s29 = smov [#allocation11]  }
  0x15   :  { %s68_s28 = sshll.u32 %s4257_s27, 4  ;;  %s100_s30 = sshll.u32 %s4258_s29, 4  ;;  %s69_s28 = int_to_ptr.vmem [resolvable:$true] %s68_s28  ;;  %s101_s30 = int_to_ptr.vmem [resolvable:$true] %s100_s30 }
  0x16   :  { %s4070_s0 = scalar_lea.vmem %s69_s28, 6144  ;;  %p4075_p6 = scmp.lt.s32.totalorder %s69_s28, %s69_s28 }
  0x17   :  { %p4071_p5 = scmp.ne.s32.totalorder %s69_s28, %s4070_s0  ;;  %p4076_p7 = scmp.lt.s32.totalorder %s4070_s0, %s4070_s0 }
  0x19   :  { %p4077_p8 = por %p4076_p7, %p4075_p6 }
  0x1b   :  { %p4078_p9 = pnand %p4077_p8, %p4071_p5 }
  0x1d   :  { %4081 = shalt.err (!%p4078_p9)
}
  0x1e   :  { %s4259_s17 = smov 64   ;;  %s4260_s18 = smov 4  }
  0x1f   :  { %74 = dma.hbm_to_vmem [thread:$0]  %s4813_s3, 6144, %s69_s28, [#allocation9], %s4259_s17, %s4259_s17, %s4260_s18  }
  0x20   :  { %s4090_s1 = scalar_lea.vmem %s101_s30, 8192  ;;  %p4095_p11 = scmp.lt.s32.totalorder %s101_s30, %s101_s30 }
  0x21   :  { %p4091_p10 = scmp.ne.s32.totalorder %s101_s30, %s4090_s1  ;;  %p4096_p12 = scmp.lt.s32.totalorder %s4090_s1, %s4090_s1 }
  0x23   :  { %p4097_p13 = por %p4096_p12, %p4095_p11 }
  0x25   :  { %p4098_p0 = pnand %p4097_p13, %p4091_p10 }
  0x27   :  { %4101 = shalt.err (!%p4098_p0)
}
  0x28   :  { %106 = dma.hbm_to_vmem [thread:$0]  %s4819_s9, 8192, %s101_s30, [#allocation12], %s4259_s17, %s4259_s17, %s4260_s18  }
  0x29   :  { %s4261_s23 = smov [#allocation2]   ;;  %s4262_s25 = smov [#allocation7]  }
  0x2a   :  { %s34_s24 = sshll.u32 %s4261_s23, 4  ;;  %s56_s3 = sshll.u32 %s4262_s25, 4  ;;  %s35_s24 = int_to_ptr.vmem [resolvable:$true] %s34_s24  ;;  %s57_s3 = int_to_ptr.vmem [resolvable:$true] %s56_s3 }
  0x2b   :  { %s4110_s26 = scalar_lea.vmem %s35_s24, 128  ;;  %p4115_p2 = scmp.lt.s32.totalorder %s35_s24, %s35_s24 }
  0x2c   :  { %p4111_p1 = scmp.ne.s32.totalorder %s35_s24, %s4110_s26  ;;  %p4116_p3 = scmp.lt.s32.totalorder %s4110_s26, %s4110_s26 }
  0x2e   :  { %p4117_p4 = por %p4116_p3, %p4115_p2 }
  0x30   :  { %p4118_p5 = pnand %p4117_p4, %p4111_p1 }
  0x32   :  { %4121 = shalt.err (!%p4118_p5)
}
  0x33   :  { %s4828_s29 = sld [smem:[#allocation26_spill]]  ;;  %s4130_s9 = scalar_lea.vmem %s57_s3, 256 }
  0x34   :  { %p4131_p6 = scmp.ne.s32.totalorder %s57_s3, %s4130_s9  ;;  %p4135_p7 = scmp.lt.s32.totalorder %s57_s3, %s57_s3 }
  0x35   :  { %p4136_p8 = scmp.lt.s32.totalorder %s4130_s9, %s4130_s9 }
  0x37   :  { %p4137_p9 = por %p4136_p8, %p4135_p7 }
  0x39   :  { %40 = dma.hbm_to_vmem [thread:$0]  %s4828_s29, 128, %s35_s24, [#allocation3], %s4259_s17, %s4259_s17, %s4260_s18  }
  0x3a   :  { %p4138_p10 = pnand %p4137_p9, %p4131_p6 }
  0x3c   :  { %4141 = shalt.err (!%p4138_p10)
}
  0x3d   :  { %s4263_s30 = smov 128   ;;  %s4264_s0 = smov 8  }
  0x3e   :  { %62 = dma.hbm_to_vmem [thread:$0]  %s4812_s2, 256, %s57_s3, [#allocation6], %s4263_s30, %s4263_s30, %s4264_s0  }
  0x3f   :  { %s4265_s1 = smov [#allocation10]   ;;  %s4266_s22 = smov [#allocation13]  }
  0x40   :  { %s82_s21 = sshll.u32 %s4265_s1, 4  ;;  %s114_s23 = sshll.u32 %s4266_s22, 4  ;;  %s83_s21 = int_to_ptr.vmem [resolvable:$true] %s82_s21  ;;  %s115_s23 = int_to_ptr.vmem [resolvable:$true] %s114_s23 }
  0x41   :  { %s4150_s24 = scalar_lea.vmem %s83_s21, 3072  ;;  %p4155_p12 = scmp.lt.s32.totalorder %s83_s21, %s83_s21 }
  0x42   :  { %p4151_p11 = scmp.ne.s32.totalorder %s83_s21, %s4150_s24  ;;  %p4156_p13 = scmp.lt.s32.totalorder %s4150_s24, %s4150_s24 }
  0x44   :  { %p4157_p0 = por %p4156_p13, %p4155_p12 }
  0x46   :  { %p4158_p1 = pnand %p4157_p0, %p4151_p11 }
  0x48   :  { %4161 = shalt.err (!%p4158_p1)
}
  0x49   :  { %88 = dma.hbm_to_vmem [thread:$0]  %s4815_s5, 3072, %s83_s21, [#allocation9], %s4259_s17, %s4259_s17, %s4260_s18  }
  0x4a   :  { %s4170_s2 = scalar_lea.vmem %s115_s23, 1024  ;;  %p4175_p3 = scmp.lt.s32.totalorder %s115_s23, %s115_s23 }
  0x4b   :  { %p4171_p2 = scmp.ne.s32.totalorder %s115_s23, %s4170_s2  ;;  %p4176_p4 = scmp.lt.s32.totalorder %s4170_s2, %s4170_s2 }
  0x4d   :  { %p4177_p5 = por %p4176_p4, %p4175_p3 }
  0x4f   :  { %p4178_p6 = pnand %p4177_p5, %p4171_p2 }
  0x51   :  { %4181 = shalt.err (!%p4178_p6)
}
  0x52   :  { %120 = dma.hbm_to_vmem [thread:$0]  %s4821_s11, 1024, %s115_s23, [#allocation12], %s4259_s17, %s4259_s17, %s4260_s18  }
  0x53   :  { %s4267_s28 = smov [#allocation14]  }
  0x54   :  { %s128_s29 = sshll.u32 %s4267_s28, 4  ;;  %s129_s29 = int_to_ptr.vmem [resolvable:$true] %s128_s29 }
  0x55   :  { %s4190_s9 = scalar_lea.vmem %s129_s29, 1024  ;;  %p4195_p8 = scmp.lt.s32.totalorder %s129_s29, %s129_s29 }
  0x56   :  { %p4191_p7 = scmp.ne.s32.totalorder %s129_s29, %s4190_s9  ;;  %p4196_p9 = scmp.lt.s32.totalorder %s4190_s9, %s4190_s9 }
  0x58   :  { %p4197_p10 = por %p4196_p9, %p4195_p8 }
  0x5a   :  { %p4198_p11 = pnand %p4197_p10, %p4191_p7 }
  0x5c   :  { %4201 = shalt.err (!%p4198_p11)
}
  0x5d   :  { %134 = dma.hbm_to_vmem [thread:$0]  %s4823_s13, 1024, %s129_s29, [#allocation15], %s4259_s17, %s4259_s17, %s4260_s18  }
  0x5e   :  { %4242 = dma.done.wait [#allocation3], 128  }
  0x5f   :  { %4243 = vsyncadd [#allocation3], 4294967168 }
  0x60   :  { %4244 = dma.done.wait [#allocation6], 272  }
  0x61   :  { %4245 = vsyncadd [#allocation6], 4294967024 }
  0x62   :  { %4246 = dma.done.wait [#allocation9], 9216  }
  0x63   :  { %4247 = vsyncadd [#allocation9], 4294958080 }
  0x64   :  { %4248 = dma.done.wait [#allocation12], 9216  }
  0x65   :  { %4249 = vsyncadd [#allocation12], 4294958080 }
  0x66   :  { %4250 = dma.done.wait [#allocation15], 1024  }
  0x67   :  { %4251 = vsyncadd [#allocation15], 4294966272  ;;  %v4268_v0 = vmov 0.0   ;;  %vm4269_vm0 = vmmov 0   ;;  %v4402_v1 = vld [vmem:[#allocation7] sm:$0xff]  ;;  %v4404_v2 = vld [vmem:[#allocation7 + $0x8] sm:$0xff] }
  0x68   :  { %3520 = vmatprep.subr.bf16.mxu0 %v4268_v0  ;;  %3522 = vmatprep.mubr.msk.bf16.mxu0 %vm4269_vm0, %v4268_v0  ;;  %v166_v3 = vpack.c.bf16 %v4404_v2, %v4402_v1  ;;  %v4408_v4 = vld [vmem:[#allocation2] sm:$0xff]   ;;  %v4410_v5 = vld [vmem:[#allocation8 + $0x78] sm:$0xff]   ;;  %vm172_vm1 = vcmask 130048   ;;  %v4415_v7 = vld [vmem:[#allocation8 + $0x70] sm:$0xff]   ;;  %vm1965_vm12 = vcmask 1041409   ;;  %vm3054_vm14 = vcmask 1041408  }
  0x69   :  { %v4412_v6 = vld [vmem:[#allocation8 + $0x38] sm:$0xff]   ;;  %3288 = vmatprep.subr.bf16.mxu1 %v4410_v5  ;;  %v4419_v8 = vld [vmem:[#allocation8 + $0x30] sm:$0xff]   ;;  %v4424_v9 = vld [vmem:[#allocation8 + $0x68] sm:$0xff]  }
  0x6a   :  { %3521 = vmatpush3.bf16.msra.mxu0 %v166_v3  ;;  %385 = vmatprep.mubr.bf16.mxu1 %v166_v3  ;;  %v4429_v10 = vld [vmem:[#allocation8 + $0x28] sm:$0xff]   ;;  %v4432_v11 = vld [vmem:[#allocation8 + $0x60] sm:$0xff]   ;;  %v4438_v13 = vld [vmem:[#allocation8 + $0x58] sm:$0xff]  }
  0x6b   :  { %3526 = vmatprep.subr.bf16.mxu0 %v4268_v0  ;;  %3289 = vmatpush3.bf16.msra.mxu1 %v4412_v6  ;;  %v4435_v12 = vld [vmem:[#allocation8 + $0x20] sm:$0xff]   ;;  %v4440_v14 = vld [vmem:[#allocation8 + $0x18] sm:$0xff]   ;;  %v4442_v15 = vld [vmem:[#allocation8 + $0x50] sm:$0xff]  }
  0x6c   :  { %3290 = vmatprep.subr.bf16.mxu1 %v4415_v7  ;;  %v4446_v16 = vld [vmem:[#allocation8 + $0x10] sm:$0xff]   ;;  %v4448_v17 = vld [vmem:[#allocation8 + $0x48] sm:$0xff]   ;;  %v4457_v19 = vld [vmem:[#allocation8 + $0x40] sm:$0xff]  }
  0x6d   :  { %3523 = vmatmul.mubr.msk.bf16.vlgmr.msra.gmra.mxu0 %vm172_vm1, %v4408_v4  ;;  %v4454_v18 = vld [vmem:[#allocation8 + $0x8] sm:$0xff]   ;;  %v4459_v20 = vld [vmem:[#allocation8] sm:$0xff]   ;;  %v4466_v26 = vld [vmem:[#allocation10 + $0x38] sm:$0xff]  }
  0x6e   :  { %3542 = vmatprep.mubr.msk.bf16.mxu0 %vm4269_vm0, %v4268_v0  ;;  %3527 = vmatpush3.bf16.msra.mxu0 %v4466_v26  ;;  %v4469_v27 = vld [vmem:[#allocation10 + $0x30] sm:$0xff]   ;;  %v4477_v30 = vld [vmem:[%s4814_s4] ss:$0 sm:$0xff]  ;;  %v4481_v39 = vld [vmem:[#allocation10 + $0x28] sm:$0xff]  }
  0x6f   :  { %3291 = vmatpush3.bf16.msra.mxu1 %v4419_v8  ;;  %3528 = vmatprep.subr.bf16.mxu0 %v4268_v0  ;;  %v4485_v40 = vld [vmem:[#allocation10 + $0x20] sm:$0xff]   ;;  %v4489_v41 = vld [vmem:[#allocation10 + $0x18] sm:$0xff]   ;;  %v4492_v42 = vld [vmem:[#allocation10 + $0x10] sm:$0xff]  }
  0x70   :  { %3292 = vmatprep.subr.bf16.mxu1 %v4424_v9  ;;  %v4496_v43 = vld [vmem:[#allocation10 + $0x8] sm:$0xff]   ;;  %v4500_v44 = vld [vmem:[#allocation10] sm:$0xff]  }
  0x71   :  { %v4523_v54 = vld [vmem:[%s4816_s6] ss:$0 sm:$0xff] }
  0x72   :  { %3529 = vmatpush3.bf16.msra.mxu0 %v4469_v27 }
  0x73   :  { %3293 = vmatpush3.bf16.msra.mxu1 %v4429_v10  ;;  %3530 = vmatprep.subr.bf16.mxu0 %v4268_v0 }
  0x74   :  { %3294 = vmatprep.subr.bf16.mxu1 %v4432_v11 }
  0x76   :  { %3531 = vmatpush3.bf16.msra.mxu0 %v4481_v39 }
  0x77   :  { %3295 = vmatpush3.bf16.msra.mxu1 %v4435_v12  ;;  %3532 = vmatprep.subr.bf16.mxu0 %v4268_v0 }
  0x78   :  { %3296 = vmatprep.subr.bf16.mxu1 %v4438_v13 }
  0x7a   :  { %3533 = vmatpush3.bf16.msra.mxu0 %v4485_v40 }
  0x7b   :  { %3297 = vmatpush3.bf16.msra.mxu1 %v4440_v14  ;;  %3534 = vmatprep.subr.bf16.mxu0 %v4268_v0 }
  0x7c   :  { %3298 = vmatprep.subr.bf16.mxu1 %v4442_v15 }
  0x7e   :  { %3535 = vmatpush3.bf16.msra.mxu0 %v4489_v41 }
  0x7f   :  { %3299 = vmatpush3.bf16.msra.mxu1 %v4446_v16  ;;  %3536 = vmatprep.subr.bf16.mxu0 %v4268_v0 }
  0x80   :  { %3300 = vmatprep.subr.bf16.mxu1 %v4448_v17 }
  0x82   :  { %3537 = vmatpush3.bf16.msra.mxu0 %v4492_v42 }
  0x83   :  { %3301 = vmatpush3.bf16.msra.mxu1 %v4454_v18  ;;  %3538 = vmatprep.subr.bf16.mxu0 %v4268_v0 }
  0x84   :  { %3302 = vmatprep.subr.bf16.mxu1 %v4457_v19 }
  0x86   :  { %3539 = vmatpush3.bf16.msra.mxu0 %v4496_v43 }
  0x87   :  { %3303 = vmatpush3.bf16.msra.mxu1 %v4459_v20  ;;  %3540 = vmatprep.subr.bf16.mxu0 %v4268_v0 }
  0x88   :  { %3546 = vmatprep.subr.bf16.mxu1 %v4268_v0 }
  0x8a   :  { %3541 = vmatpush3.bf16.msra.mxu0 %v4500_v44 }
  0x8b   :  { %3321 = vmatprep.subr.bf16.mxu0 %v4410_v5 }
 0x12d   :  { %v210_v21 = vpop.f32.mrf.mxu0 }
 0x12f   :  { %v3524_v22 = vpop.f32.mrf.mxu0 }
 0x131   :  { %v213_v23 = vpop.f32.mrf.mxu0 }
 0x132   :  { %v217_v24 = vpack.c.bf16 %v213_v23, %v210_v21 }
 0x133   :  { %v3525_v25 = vpop.f32.mrf.mxu0 }
 0x134   :  { %386 = vmatmul.mubr.bf16.vlgmr.msra.gmra.mxu1 %v217_v24 }
 0x135   :  { %3548 = vmatprep.mubr.msk.bf16.mxu1 %vm4269_vm0, %v4268_v0 }
 0x1f4   :  { %v3304_v28 = vpop.f32.mrf.mxu1 }
 0x1f6   :  { %v3305_v29 = vpop.f32.mrf.mxu1 }
 0x1f7   :  { %v3306_v31 = vadd.f32 %v3305_v29, %v3304_v28  ;;  %v4530_v29 = vld [vmem:[%s4817_s7] ss:$0 sm:$0xff] }
 0x1f8   :  { %v3307_v32 = vpop.f32.mrf.mxu1 }
 0x1f9   :  { %v388_v33 = vadd.f32 %v3306_v31, %v4477_v30 }
 0x1fa   :  { %v3308_v34 = vpop.f32.mrf.mxu1 }
 0x1fb   :  { %v3309_v35 = vadd.f32 %v3308_v34, %v3307_v32  ;;  %v394_v36 = vmul.f32 %v388_v33, %v388_v33 }
 0x1fd   :  { %v391_v37 = vadd.f32 %v3309_v35, %v4477_v30  ;;  %396 = vadd.xlane.f32.xlu0 %v394_v36 }
 0x1ff   :  { %v395_v38 = vmul.f32 %v391_v37, %v391_v37 }
 0x201   :  { %398 = vadd.xlane.f32.xlu0 %v395_v38 }
 0x286   :  { %v397_v45 = vpop.xlane.xlu0 %396 }
 0x287   :  { %v400_v46 = vmax.f32 %v397_v45, 1e-24 }
 0x289   :  { %4014 = vrsqrt.f32 %v400_v46 }
 0x28a   :  { %v399_v47 = vpop.xlane.xlu0 %398 }
 0x28b   :  { %v401_v48 = vmax.f32 %v399_v47, 1e-24 }
 0x28d   :  { %4016 = vrsqrt.f32 %v401_v48 }
 0x296   :  { %v4015_v49 = vpop.eup %4014 }
 0x297   :  { %v404_v51 = vmul.f32 %v4015_v49, %v388_v33  ;;  %v4535_v33 = vld [vmem:[%s4818_s8] ss:$0 sm:$0xff] }
 0x29a   :  { %v4017_v50 = vpop.eup %4016 }
 0x29b   :  { %v405_v52 = vmul.f32 %v4017_v50, %v391_v37 }
 0x29d   :  { %v406_v53 = vpack.c.bf16 %v405_v52, %v404_v51 }
 0x29f   :  { %3543 = vmatmul.mubr.bf16.vlgmr.msra.gmra.mxu0 %v406_v53 }
 0x2a0   :  { %3322 = vmatpush3.bf16.msra.mxu0 %v4412_v6 }
 0x2a1   :  { %3323 = vmatprep.subr.bf16.mxu0 %v4415_v7 }
 0x2a4   :  { %3324 = vmatpush3.bf16.msra.mxu0 %v4419_v8 }
 0x2a5   :  { %3325 = vmatprep.subr.bf16.mxu0 %v4424_v9 }
 0x2a8   :  { %3326 = vmatpush3.bf16.msra.mxu0 %v4429_v10 }
 0x2a9   :  { %3327 = vmatprep.subr.bf16.mxu0 %v4432_v11 }
 0x2ac   :  { %3328 = vmatpush3.bf16.msra.mxu0 %v4435_v12 }
 0x2ad   :  { %3329 = vmatprep.subr.bf16.mxu0 %v4438_v13 }
 0x2b0   :  { %3330 = vmatpush3.bf16.msra.mxu0 %v4440_v14 }
 0x2b1   :  { %3331 = vmatprep.subr.bf16.mxu0 %v4442_v15 }
 0x2b4   :  { %3332 = vmatpush3.bf16.msra.mxu0 %v4446_v16 }
 0x2b5   :  { %3333 = vmatprep.subr.bf16.mxu0 %v4448_v17 }
 0x2b8   :  { %3334 = vmatpush3.bf16.msra.mxu0 %v4454_v18 }
 0x2b9   :  { %3335 = vmatprep.subr.bf16.mxu0 %v4457_v19 }
 0x2bc   :  { %3336 = vmatpush3.bf16.msra.mxu0 %v4459_v20 }
 0x35f   :  { %v512_v55 = vpop.f32.mrf.mxu0 }
 0x360   :  { %v513_v56 = vadd.f32 %v4523_v54, %v512_v55 }
 0x361   :  { %v3544_v57 = vpop.f32.mrf.mxu0 }
 0x362   :  { %v519_v59 = vmul.f32 0.2, %v513_v56 }
 0x363   :  { %v515_v58 = vpop.f32.mrf.mxu0 }
 0x364   :  { %v516_v60 = vadd.f32 %v4523_v54, %v515_v58  ;;  %v521_v63 = vmax.f32 %v513_v56, %v519_v59 }
 0x365   :  { %v3545_v61 = vpop.f32.mrf.mxu0 }
 0x366   :  { %v520_v62 = vmul.f32 0.2, %v516_v60 }
 0x368   :  { %v522_v3 = vmax.f32 %v516_v60, %v520_v62 }
 0x36a   :  { %v523_v5 = vadd.f32 %v522_v3, %v521_v63 }
 0x36c   :  { %v524_v6 = vrot.slane %v523_v5, 4 }
 0x36e   :  { %v525_v7 = vadd.f32 %v524_v6, %v523_v5 }
 0x370   :  { %v526_v8 = vrot.slane %v525_v7, 2 }
 0x372   :  { %v527_v9 = vadd.f32 %v526_v8, %v525_v7 }
 0x374   :  { %v528_v10 = vrot.slane %v527_v9, 1 }
 0x376   :  { %v529_v11 = vadd.f32 %v528_v10, %v527_v9 }
 0x378   :  { %v531_v12 = vmul.f32 0.0625, %v529_v11 }
 0x37a   :  { %v532_v13 = vsub.f32 %v521_v63, %v531_v12  ;;  %v533_v14 = vsub.f32 %v522_v3, %v531_v12 }
 0x37c   :  { %v534_v15 = vmul.f32 %v532_v13, %v532_v13  ;;  %v535_v16 = vmul.f32 %v533_v14, %v533_v14 }
 0x37e   :  { %v536_v17 = vadd.f32 %v535_v16, %v534_v15 }
 0x380   :  { %v537_v18 = vrot.slane %v536_v17, 4 }
 0x382   :  { %v538_v19 = vadd.f32 %v537_v18, %v536_v17 }
 0x384   :  { %v539_v20 = vrot.slane %v538_v19, 2 }
 0x386   :  { %v540_v21 = vadd.f32 %v539_v20, %v538_v19 }
 0x388   :  { %v541_v22 = vrot.slane %v540_v21, 1 }
 0x38a   :  { %v542_v23 = vadd.f32 %v541_v22, %v540_v21 }
 0x38c   :  { %v543_v24 = vmul.f32 0.0625, %v542_v23 }
 0x38e   :  { %v544_v25 = vadd.f32 1e-05, %v543_v24 }
 0x390   :  { %4018 = vrsqrt.f32 %v544_v25 }
 0x39d   :  { %v4019_v28 = vpop.eup %4018 }
 0x39e   :  { %v546_v31 = vmul.f32 %v4019_v28, %v532_v13  ;;  %v547_v32 = vmul.f32 %v4019_v28, %v533_v14 }
 0x3a0   :  { %v555_v34 = vmul.f32 %v4530_v29, %v546_v31  ;;  %v556_v35 = vmul.f32 %v4530_v29, %v547_v32 }
 0x3a2   :  { %v565_v36 = vadd.f32 %v4535_v33, %v556_v35  ;;  %v564_v37 = vadd.f32 %v4535_v33, %v555_v34 }
 0x3a4   :  { %v4542_v38 = vadd.f32 %v564_v37, %v4402_v1  ;;  %v4545_v45 = vadd.f32 %v565_v36, %v4404_v2 }
 0x3a6   :  { %v568_v46 = vpack.c.bf16 %v4545_v45, %v4542_v38 }
 0x3a8   :  { %3547 = vmatpush3.bf16.msra.mxu1 %v568_v46  ;;  %643 = vmatprep.mubr.bf16.mxu0 %v568_v46 }
 0x3a9   :  { %3552 = vmatprep.subr.bf16.mxu1 %v4268_v0 }
 0x3ab   :  { %3549 = vmatmul.mubr.msk.bf16.vlgmr.msra.gmra.mxu1 %vm172_vm1, %v4408_v4 }
 0x3ac   :  { %3553 = vmatpush3.bf16.msra.mxu1 %v4466_v26  ;;  %3568 = vmatprep.mubr.msk.bf16.mxu1 %vm4269_vm0, %v4268_v0 }
 0x3ad   :  { %3554 = vmatprep.subr.bf16.mxu1 %v4268_v0 }
 0x3b0   :  { %3555 = vmatpush3.bf16.msra.mxu1 %v4469_v27 }
 0x3b1   :  { %3556 = vmatprep.subr.bf16.mxu1 %v4268_v0 }
 0x3b4   :  { %3557 = vmatpush3.bf16.msra.mxu1 %v4481_v39 }
 0x3b5   :  { %3558 = vmatprep.subr.bf16.mxu1 %v4268_v0 }
 0x3b8   :  { %3559 = vmatpush3.bf16.msra.mxu1 %v4485_v40 }
 0x3b9   :  { %3560 = vmatprep.subr.bf16.mxu1 %v4268_v0 }
 0x3bc   :  { %3561 = vmatpush3.bf16.msra.mxu1 %v4489_v41 }
 0x3bd   :  { %3562 = vmatprep.subr.bf16.mxu1 %v4268_v0 }
 0x3c0   :  { %3563 = vmatpush3.bf16.msra.mxu1 %v4492_v42 }
 0x3c1   :  { %3564 = vmatprep.subr.bf16.mxu1 %v4268_v0 }
 0x3c4   :  { %3565 = vmatpush3.bf16.msra.mxu1 %v4496_v43 }
 0x3c5   :  { %3566 = vmatprep.subr.bf16.mxu1 %v4268_v0 }
 0x3c8   :  { %3567 = vmatpush3.bf16.msra.mxu1 %v4500_v44 }
 0x46b   :  { %v603_v1 = vpop.f32.mrf.mxu1 }
 0x46d   :  { %v3550_v2 = vpop.f32.mrf.mxu1 }
 0x46f   :  { %v606_v4 = vpop.f32.mrf.mxu1 }
 0x470   :  { %v610_v26 = vpack.c.bf16 %v606_v4, %v603_v1 }
 0x471   :  { %v3551_v27 = vpop.f32.mrf.mxu1 }
 0x472   :  { %644 = vmatmul.mubr.bf16.vlgmr.msra.gmra.mxu0 %v610_v26 }
 0x532   :  { %v3337_v39 = vpop.f32.mrf.mxu0 }
 0x534   :  { %v3338_v40 = vpop.f32.mrf.mxu0 }
 0x535   :  { %v3339_v41 = vadd.f32 %v3338_v40, %v3337_v39 }
 0x536   :  { %v3340_v47 = vpop.f32.mrf.mxu0 }
 0x537   :  { %v646_v42 = vadd.f32 %v3339_v41, %v4477_v30 }
 0x538   :  { %v3341_v48 = vpop.f32.mrf.mxu0 }
 0x539   :  { %v3342_v49 = vadd.f32 %v3341_v48, %v3340_v47  ;;  %v652_v50 = vmul.f32 %v646_v42, %v646_v42 }
 0x53b   :  { %v649_v43 = vadd.f32 %v3342_v49, %v4477_v30  ;;  %654 = vadd.xlane.f32.xlu1 %v652_v50 }
 0x53d   :  { %v653_v51 = vmul.f32 %v649_v43, %v649_v43 }
 0x53f   :  { %656 = vadd.xlane.f32.xlu1 %v653_v51 }
 0x5c4   :  { %v655_v44 = vpop.xlane.xlu1 %654 }
 0x5c5   :  { %v658_v52 = vmax.f32 %v655_v44, 1e-24 }
 0x5c7   :  { %4020 = vrsqrt.f32 %v658_v52 }
 0x5c8   :  { %v657_v53 = vpop.xlane.xlu1 %656 }
 0x5c9   :  { %v659_v55 = vmax.f32 %v657_v53, 1e-24 }
 0x5cb   :  { %4022 = vrsqrt.f32 %v659_v55 }
 0x5d4   :  { %v4021_v56 = vpop.eup %4020 }
 0x5d5   :  { %v662_v58 = vmul.f32 %v4021_v56, %v646_v42 }
 0x5d8   :  { %v4023_v57 = vpop.eup %4022 }
 0x5d9   :  { %v663_v59 = vmul.f32 %v4023_v57, %v649_v43 }
 0x5db   :  { %v664_v60 = vpack.c.bf16 %v663_v59, %v662_v58 }
 0x5dd   :  { %3569 = vmatmul.mubr.bf16.vlgmr.msra.gmra.mxu1 %v664_v60 }
 0x69d   :  { %v699_v61 = vpop.f32.mrf.mxu1 }
 0x69e   :  { %v700_v62 = vadd.f32 %v4523_v54, %v699_v61 }
 0x69f   :  { %v3570_v63 = vpop.f32.mrf.mxu1 }
 0x6a0   :  { %v706_v3 = vmul.f32 0.2, %v700_v62 }
 0x6a1   :  { %v702_v30 = vpop.f32.mrf.mxu1 }
 0x6a2   :  { %v703_v5 = vadd.f32 %v4523_v54, %v702_v30  ;;  %v708_v8 = vmax.f32 %v700_v62, %v706_v3 }
 0x6a3   :  { %v3571_v6 = vpop.f32.mrf.mxu1 }
 0x6a4   :  { %v707_v7 = vmul.f32 0.2, %v703_v5 }
 0x6a6   :  { %v709_v9 = vmax.f32 %v703_v5, %v707_v7 }
 0x6a8   :  { %v710_v10 = vadd.f32 %v709_v9, %v708_v8 }
 0x6aa   :  { %v711_v11 = vrot.slane %v710_v10, 4 }
 0x6ac   :  { %v712_v12 = vadd.f32 %v711_v11, %v710_v10 }
 0x6ae   :  { %v713_v13 = vrot.slane %v712_v12, 2 }
 0x6b0   :  { %v714_v14 = vadd.f32 %v713_v13, %v712_v12 }
 0x6b2   :  { %v715_v15 = vrot.slane %v714_v14, 1 }
 0x6b4   :  { %v716_v16 = vadd.f32 %v715_v15, %v714_v14 }
 0x6b6   :  { %v717_v17 = vmul.f32 0.0625, %v716_v16 }
 0x6b8   :  { %v718_v18 = vsub.f32 %v708_v8, %v717_v17  ;;  %v719_v19 = vsub.f32 %v709_v9, %v717_v17 }
 0x6ba   :  { %v720_v20 = vmul.f32 %v718_v18, %v718_v18  ;;  %v721_v21 = vmul.f32 %v719_v19, %v719_v19 }
 0x6bc   :  { %v722_v22 = vadd.f32 %v721_v21, %v720_v20  ;;  %v3888_v20 = vld [vmem:[#allocation8 + $0xf0] sm:$0xff]  }
 0x6bd   :  { %v3889_v21 = vld [vmem:[#allocation8 + $0xb0] sm:$0xff]  }
 0x6be   :  { %v723_v23 = vrot.slane %v722_v22, 4 }
 0x6c0   :  { %v724_v24 = vadd.f32 %v723_v23, %v722_v22  ;;  %v3890_v22 = vld [vmem:[#allocation8 + $0xe8] sm:$0xff]  }
 0x6c1   :  { %v3891_v23 = vld [vmem:[#allocation8 + $0xa8] sm:$0xff]  }
 0x6c2   :  { %v725_v54 = vrot.slane %v724_v24, 2 }
 0x6c4   :  { %v726_v25 = vadd.f32 %v725_v54, %v724_v24  ;;  %v3892_v24 = vld [vmem:[#allocation8 + $0xe0] sm:$0xff]  }
 0x6c5   :  { %v3893_v54 = vld [vmem:[#allocation8 + $0xa0] sm:$0xff]  }
 0x6c6   :  { %v727_v28 = vrot.slane %v726_v25, 1 }
 0x6c8   :  { %v728_v31 = vadd.f32 %v727_v28, %v726_v25  ;;  %v3894_v25 = vld [vmem:[#allocation8 + $0xd8] sm:$0xff]  }
 0x6c9   :  { %v3895_v28 = vld [vmem:[#allocation8 + $0x98] sm:$0xff]  }
 0x6ca   :  { %v729_v32 = vmul.f32 0.0625, %v728_v31  ;;  %v3896_v31 = vld [vmem:[#allocation8 + $0xd0] sm:$0xff]  }
 0x6cc   :  { %v730_v34 = vadd.f32 1e-05, %v729_v32  ;;  %v3897_v32 = vld [vmem:[#allocation8 + $0x90] sm:$0xff]  }
 0x6ce   :  { %4024 = vrsqrt.f32 %v730_v34  ;;  %v3898_v34 = vld [vmem:[#allocation8 + $0xc8] sm:$0xff]  }
 0x6db   :  { %v4025_v35 = vpop.eup %4024 }
 0x6dc   :  { %v732_v36 = vmul.f32 %v4025_v35, %v718_v18  ;;  %v733_v37 = vmul.f32 %v4025_v35, %v719_v19  ;;  %v3886_v18 = vld [vmem:[#allocation8 + $0xf8] sm:$0xff]  }
 0x6dd   :  { %v3887_v19 = vld [vmem:[#allocation8 + $0xb8] sm:$0xff]  }
 0x6de   :  { %v734_v46 = vmul.f32 %v4530_v29, %v732_v36  ;;  %v735_v1 = vmul.f32 %v4530_v29, %v733_v37  ;;  %v853_v29 = vlaneseq }
 0x6e0   :  { %v736_v2 = vadd.f32 %v4535_v33, %v734_v46  ;;  %v737_v4 = vadd.f32 %v4535_v33, %v735_v1  ;;  %v854_v33 = vshrl.u32 %v853_v29, 7  ;;  %v4580_v51 = vand.u32 127, %v853_v29 }
 0x6e2   :  { %v738_v26 = vadd.f32 %v736_v2, %v4542_v38  ;;  %v739_v27 = vadd.f32 %v737_v4, %v4545_v45  ;;  %v863_v38 = vld [vmem:[#allocation5] sm:$0x1]  ;;  %v855_v45 = vsub.s32 0, %v854_v33  ;;  %v907_v43 = vadd.s32 8, %v854_v33 }
 0x6e3   :  { %v864_v41 = vcvt.s32.f32 %v863_v38  ;;  %vm910_vm4 = vcmp.ne.s32.totalorder %v854_v33, %v4580_v51  ;;  %v922_v5 = vcvt.s32.f32 %v4580_v51  ;;  %vm3052_vm13 = vcmp.lt.s32.totalorder %v4580_v51, 2 }
 0x6e4   :  { %3572 = vmatprep.subr.mxu0 %v739_v27  ;;  %3576 = vmatprep.mubr.f32.mxu0 %v738_v26  ;;  %v741_v39 = vmul.f32 %v739_v27, %v739_v27  ;;  %v740_v40 = vmul.f32 %v738_v26, %v738_v26  ;;  %vm911_vm2 = vcmp.ne.s32.totalorder %v907_v43, %v4580_v51 }
 0x6e5   :  { %3573 = vmatpush3.xpose.msra.mxu0 %v739_v27  ;;  %v869_v47 = vrot.slane %v864_v41, %v855_v45 }
 0x6e6   :  { %744 = vadd.xlane.f32.xlu1 %v741_v39  ;;  %3574 = vmatprep.subr.mxu0 %v738_v26  ;;  %v3900_v39 = vld [vmem:[#allocation8 + $0xc0] sm:$0xff]  }
 0x6e7   :  { %742 = vadd.xlane.f32.xlu0 %v740_v40  ;;  %v3901_v40 = vld [vmem:[#allocation8 + $0x80] sm:$0xff]  }
 0x6e9   :  { %3575 = vmatpush3.xpose.msra.mxu0 %v738_v26 }
 0x6ea   :  { %3579 = vmatprep.subr.mxu0 %v739_v27 }
 0x6ec   :  { %3577 = vmatmul.mubr.f32.vlgmr.msra.gmra.mxu0 %v739_v27 }
 0x6ed   :  { %3580 = vmatpush3.msra.mxu0 %v739_v27  ;;  %v3899_v27 = vld [vmem:[#allocation8 + $0x88] sm:$0xff]  }
 0x6ee   :  { %3581 = vmatprep.subr.mxu0 %v738_v26 }
 0x6ef   :  { %3582 = vmatpush3.msra.mxu0 %v738_v26 }
 0x6f0   :  { %3593 = vmatprep.subr.bf16.mxu0 %v4268_v0 }
 0x719   :  { %871 = vxpose.xlu1.b32.start [1/2] (short) (narrow) %v869_v47, 16 }
 0x71d   :  { %872 = vxpose.xlu1.b32.end [2/2] (short) (narrow) %v869_v47, 16 }
 0x76f   :  { %v745_v48 = vpop.xlane.xlu1 %744 }
 0x770   :  { %v743_v42 = vpop.xlane.xlu0 %742 }
 0x771   :  { %821 = vxpose.xlu0.b32.start [1/2] (short) (narrow) %v743_v42, 8 }
 0x775   :  { %822 = vxpose.xlu0.b32.end [2/2] (short) (narrow) %v745_v48, 8 }
 0x795   :  { %v887_v49 = vpop.trf.xlu1 }
 0x796   :  { %vm903_vm5 = vcmp.eq.f32.partialorder %v869_v47, %v887_v49  ;;  %v3139_v49 = vld [vmem:[%s4814_s4 + $0x1] ss:$0 sm:$0xff] }
 0x797   :  { %vm912_vm7 = vmand %vm903_vm5, %vm910_vm4 }
 0x799   :  { %v888_v44 = vpop.trf.xlu1 }
 0x79a   :  { %vm904_vm3 = vcmp.eq.f32.partialorder %v869_v47, %v888_v44  ;;  %v3902_v47 = vld [vmem:[#allocation10 + $0x78] sm:$0xff]  }
 0x79b   :  { %vm913_vm6 = vmand %vm904_vm3, %vm911_vm2 }
 0x7ac   :  { %v3578_v50 = vpop.f32.mrf.mxu0 }
 0x7ad   :  { %v860_v56 = vmul.f32 2.0, %v3578_v50 }
 0x7ae   :  { %v812_v52 = vpop.f32.mrf.mxu0 }
 0x7af   :  { %v859_v57 = vmul.f32 2.0, %v812_v52 }
 0x7ed   :  { %v837_v53 = vpop.trf.xlu0 }
 0x7ee   :  { %v856_v55 = vrot.slane %v837_v53, %v855_v45 }
 0x7f0   :  { %v857_v58 = vadd.f32 %v856_v55, %v743_v42  ;;  %v858_v59 = vadd.f32 %v856_v55, %v745_v48  ;;  %v3903_v42 = vld [vmem:[#allocation10 + $0x70] sm:$0xff]  }
 0x7f2   :  { %v862_v60 = vsub.f32 %v858_v59, %v860_v56  ;;  %v861_v61 = vsub.f32 %v857_v58, %v859_v57  ;;  %v3904_v59 = vld [vmem:[#allocation10 + $0x68] sm:$0xff]  }
 0x7f4   :  { %v915_v62 = vsel %vm913_vm6, %v862_v60, inf  ;;  %v914_v63 = vsel %vm912_vm7, %v861_v61, inf  ;;  %v3905_v60 = vld [vmem:[#allocation10 + $0x60] sm:$0xff]   ;;  %v3906_v61 = vld [vmem:[#allocation10 + $0x58] sm:$0xff]  }
 0x7f5   :  { %v919_v30 = vsel %vm172_vm1, %v915_v62, inf  ;;  %v916_v3 = vsel %vm172_vm1, %v914_v63, inf }
 0x7f6   :  { %920 = vmin.xlane.f32.xlu1 %v919_v30  ;;  %917 = vmin.xlane.f32.xlu0 %v916_v3  ;;  %v3909_v30 = vld [vmem:[#allocation10 + $0x40] sm:$0xff]  }
 0x87f   :  { %v921_v6 = vpop.xlane.xlu1 %920  ;;  %v918_v7 = vpop.xlane.xlu0 %917 }
 0x880   :  { %vm924_vm8 = vcmp.le.f32.partialorder %v915_v62, %v921_v6  ;;  %vm923_vm9 = vcmp.le.f32.partialorder %v914_v63, %v918_v7  ;;  %v3907_v62 = vld [vmem:[#allocation10 + $0x50] sm:$0xff]   ;;  %v3908_v63 = vld [vmem:[#allocation10 + $0x48] sm:$0xff]  }
 0x881   :  { %v926_v8 = vsel %vm924_vm8, %v922_v5, 16.0  ;;  %v925_v9 = vsel %vm923_vm9, %v922_v5, 16.0 }
 0x882   :  { %v930_v10 = vsel %vm172_vm1, %v926_v8, inf  ;;  %v927_v11 = vsel %vm172_vm1, %v925_v9, inf }
 0x883   :  { %931 = vmin.xlane.f32.xlu1 %v930_v10  ;;  %928 = vmin.xlane.f32.xlu0 %v927_v11 }
 0x90c   :  { %v932_v12 = vpop.xlane.xlu1 %931  ;;  %v929_v13 = vpop.xlane.xlu0 %928 }
 0x90d   :  { %vm934_vm10 = vcmp.eq.f32.partialorder %v922_v5, %v932_v12  ;;  %vm933_vm11 = vcmp.eq.f32.partialorder %v922_v5, %v929_v13  ;;  %v3910_v13 = vld [vmem:[#allocation8 + $0x178] sm:$0xff]  }
 0x90e   :  { %v3132_v14 = vsel %vm934_vm10, 1.0, %v4268_v0  ;;  %v3131_v15 = vsel %vm933_vm11, 1.0, %v4268_v0 }
 0x90f   :  { %939 = vxpose.xlu0.b32.start [1/2] (short) (narrow) %v3131_v15, 16  ;;  %3583 = vmatprep.mubr.msk.f32.mxu0 %vm172_vm1, %v3131_v15 }
 0x910   :  { %3590 = vmatprep.mubr.msk.f32.mxu1 %vm172_vm1, %v3131_v15  ;;  %3584 = vmatmul.mubr.msk.f32.vlgmr.msra.gmra.mxu0 %vm172_vm1, %v3132_v14  ;;  %v3912_v15 = vld [vmem:[#allocation8 + $0x170] sm:$0xff]  }
 0x911   :  { %3595 = vmatprep.mubr.msk.bf16.mxu0 %vm4269_vm0, %v4268_v0 }
 0x913   :  { %940 = vxpose.xlu0.b32.end [2/2] (short) (narrow) %v3132_v14, 16 }
 0x98b   :  { %v955_v35 = vpop.trf.xlu0 }
 0x98f   :  { %v956_v4 = vpop.trf.xlu0 }
 0x990   :  { %v4597_v26 = vpack.c.bf16 %v956_v4, %v955_v35 }
 0x9d0   :  { %v3585_v16 = vpop.f32.mrf.mxu0 }
 0x9d1   :  { %3586 = vmatprep.subr.mxu1 %v3585_v16 }
 0x9d2   :  { %v1044_v17 = vpop.f32.mrf.mxu0  ;;  %3587 = vmatpush3.msra.mxu1 %v3585_v16 }
 0x9d3   :  { %3588 = vmatprep.subr.mxu1 %v1044_v17 }
 0x9d4   :  { %3589 = vmatpush3.msra.mxu1 %v1044_v17 }
 0x9d5   :  { %3591 = vmatmul.mubr.msk.f32.vlgmr.msra.gmra.mxu1 %vm172_vm1, %v3132_v14  ;;  %3366 = vmatprep.subr.bf16.mxu1 %v3886_v18  ;;  %v3911_v14 = vld [vmem:[#allocation8 + $0x138] sm:$0xff]   ;;  %v3915_v18 = vld [vmem:[#allocation8 + $0x128] sm:$0xff]  }
 0x9d6   :  { %3367 = vmatpush3.bf16.msra.mxu1 %v3887_v19  ;;  %v3916_v19 = vld [vmem:[#allocation8 + $0x160] sm:$0xff]  }
 0x9d7   :  { %3368 = vmatprep.subr.bf16.mxu1 %v3888_v20  ;;  %v3917_v20 = vld [vmem:[#allocation8 + $0x120] sm:$0xff]  }
 0x9da   :  { %3369 = vmatpush3.bf16.msra.mxu1 %v3889_v21  ;;  %v3918_v21 = vld [vmem:[#allocation8 + $0x158] sm:$0xff]  }
 0x9db   :  { %3370 = vmatprep.subr.bf16.mxu1 %v3890_v22  ;;  %v3919_v22 = vld [vmem:[#allocation8 + $0x118] sm:$0xff]  }
 0x9de   :  { %3371 = vmatpush3.bf16.msra.mxu1 %v3891_v23  ;;  %v3920_v23 = vld [vmem:[#allocation8 + $0x150] sm:$0xff]  }
 0x9df   :  { %3372 = vmatprep.subr.bf16.mxu1 %v3892_v24  ;;  %v3921_v24 = vld [vmem:[#allocation8 + $0x110] sm:$0xff]  }
 0x9e2   :  { %3373 = vmatpush3.bf16.msra.mxu1 %v3893_v54  ;;  %v3922_v54 = vld [vmem:[#allocation8 + $0x148] sm:$0xff]  }
 0x9e3   :  { %3374 = vmatprep.subr.bf16.mxu1 %v3894_v25  ;;  %v3157_v25 = vld [vmem:[%s4816_s6 + $0x1] ss:$0 sm:$0xff] }
 0x9e6   :  { %3375 = vmatpush3.bf16.msra.mxu1 %v3895_v28 }
 0x9e7   :  { %3376 = vmatprep.subr.bf16.mxu1 %v3896_v31 }
 0x9ea   :  { %3377 = vmatpush3.bf16.msra.mxu1 %v3897_v32 }
 0x9eb   :  { %3378 = vmatprep.subr.bf16.mxu1 %v3898_v34 }
 0x9ee   :  { %3379 = vmatpush3.bf16.msra.mxu1 %v3899_v27 }
 0x9ef   :  { %3380 = vmatprep.subr.bf16.mxu1 %v3900_v39 }
 0x9f2   :  { %3381 = vmatpush3.bf16.msra.mxu1 %v3901_v40 }
 0x9f3   :  { %3619 = vmatprep.subr.bf16.mxu1 %v4268_v0 }
 0xa95   :  { %v3592_v36 = vpop.f32.mrf.mxu1 }
 0xa96   :  { %v1129_v46 = vadd.f32 %v3592_v36, %v3585_v16  ;;  %v3913_v16 = vld [vmem:[#allocation8 + $0x130] sm:$0xff]  }
 0xa97   :  { %v1119_v37 = vpop.f32.mrf.mxu1 }
 0xa98   :  { %v1128_v1 = vadd.f32 %v1119_v37, %v1044_v17  ;;  %v3914_v17 = vld [vmem:[#allocation8 + $0x168] sm:$0xff]  }
 0xa9a   :  { %v1130_v2 = vpack.c.bf16 %v1129_v46, %v1128_v1 }
 0xa9c   :  { %3594 = vmatpush3.bf16.msra.mxu0 %v1130_v2  ;;  %1345 = vmatprep.mubr.bf16.mxu1 %v1130_v2 }
 0xa9d   :  { %3599 = vmatprep.subr.bf16.mxu0 %v4268_v0 }
 0xa9f   :  { %3596 = vmatmul.mubr.msk.bf16.vlgmr.msra.gmra.mxu0 %vm172_vm1, %v4597_v26 }
 0xaa0   :  { %3615 = vmatprep.mubr.msk.bf16.mxu0 %vm4269_vm0, %v4268_v0  ;;  %3600 = vmatpush3.bf16.msra.mxu0 %v3902_v47 }
 0xaa1   :  { %3601 = vmatprep.subr.bf16.mxu0 %v4268_v0 }
 0xaa4   :  { %3602 = vmatpush3.bf16.msra.mxu0 %v3903_v42 }
 0xaa5   :  { %3603 = vmatprep.subr.bf16.mxu0 %v4268_v0 }
 0xaa8   :  { %3604 = vmatpush3.bf16.msra.mxu0 %v3904_v59  ;;  %v3167_v59 = vld [vmem:[%s4817_s7 + $0x1] ss:$0 sm:$0xff] }
 0xaa9   :  { %3605 = vmatprep.subr.bf16.mxu0 %v4268_v0 }
 0xaac   :  { %3606 = vmatpush3.bf16.msra.mxu0 %v3905_v60 }
 0xaad   :  { %3607 = vmatprep.subr.bf16.mxu0 %v4268_v0 }
 0xab0   :  { %3608 = vmatpush3.bf16.msra.mxu0 %v3906_v61 }
 0xab1   :  { %3609 = vmatprep.subr.bf16.mxu0 %v4268_v0 }
 0xab4   :  { %3610 = vmatpush3.bf16.msra.mxu0 %v3907_v62  ;;  %v3169_v62 = vld [vmem:[%s4818_s8 + $0x1] ss:$0 sm:$0xff] }
 0xab5   :  { %3611 = vmatprep.subr.bf16.mxu0 %v4268_v0 }
 0xab8   :  { %3612 = vmatpush3.bf16.msra.mxu0 %v3908_v63 }
 0xab9   :  { %3613 = vmatprep.subr.bf16.mxu0 %v4268_v0 }
 0xabc   :  { %3614 = vmatpush3.bf16.msra.mxu0 %v3909_v30 }
 0xabd   :  { %3399 = vmatprep.subr.bf16.mxu0 %v3910_v13 }
 0xb5f   :  { %v1168_v29 = vpop.f32.mrf.mxu0 }
 0xb61   :  { %v3597_v33 = vpop.f32.mrf.mxu0 }
 0xb63   :  { %v1171_v38 = vpop.f32.mrf.mxu0 }
 0xb64   :  { %v1175_v45 = vpack.c.bf16 %v1171_v38, %v1168_v29 }
 0xb65   :  { %v3598_v41 = vpop.f32.mrf.mxu0 }
 0xb66   :  { %1346 = vmatmul.mubr.bf16.vlgmr.msra.gmra.mxu1 %v1175_v45 }
 0xb67   :  { %3621 = vmatprep.mubr.msk.bf16.mxu1 %vm4269_vm0, %v4268_v0 }
 0xc26   :  { %v3382_v48 = vpop.f32.mrf.mxu1 }
 0xc28   :  { %v3383_v50 = vpop.f32.mrf.mxu1 }
 0xc29   :  { %v3384_v43 = vadd.f32 %v3383_v50, %v3382_v48 }
 0xc2a   :  { %v3385_v44 = vpop.f32.mrf.mxu1 }
 0xc2b   :  { %v1348_v52 = vadd.f32 %v3384_v43, %v3139_v49 }
 0xc2c   :  { %v3386_v53 = vpop.f32.mrf.mxu1 }
 0xc2d   :  { %v3387_v55 = vadd.f32 %v3386_v53, %v3385_v44  ;;  %v1354_v56 = vmul.f32 %v1348_v52, %v1348_v52 }
 0xc2f   :  { %v1351_v57 = vadd.f32 %v3387_v55, %v3139_v49  ;;  %1356 = vadd.xlane.f32.xlu1 %v1354_v56 }
 0xc31   :  { %v1355_v58 = vmul.f32 %v1351_v57, %v1351_v57 }
 0xc33   :  { %1358 = vadd.xlane.f32.xlu1 %v1355_v58 }
 0xcb8   :  { %v1357_v3 = vpop.xlane.xlu1 %1356 }
 0xcb9   :  { %v1360_v5 = vmax.f32 %v1357_v3, 1e-24 }
 0xcbb   :  { %4026 = vrsqrt.f32 %v1360_v5 }
 0xcbc   :  { %v1359_v6 = vpop.xlane.xlu1 %1358 }
 0xcbd   :  { %v1361_v7 = vmax.f32 %v1359_v6, 1e-24 }
 0xcbf   :  { %4028 = vrsqrt.f32 %v1361_v7  ;;  %v3923_v7 = vld [vmem:[#allocation8 + $0x108] sm:$0xff]  }
 0xcc8   :  { %v4027_v8 = vpop.eup %4026 }
 0xcc9   :  { %v1364_v10 = vmul.f32 %v4027_v8, %v1348_v52  ;;  %v3924_v8 = vld [vmem:[#allocation8 + $0x140] sm:$0xff]  }
 0xccc   :  { %v4029_v9 = vpop.eup %4028 }
 0xccd   :  { %v1365_v11 = vmul.f32 %v4029_v9, %v1351_v57  ;;  %v3925_v9 = vld [vmem:[#allocation8 + $0x100] sm:$0xff]  }
 0xccf   :  { %v1366_v12 = vpack.c.bf16 %v1365_v11, %v1364_v10 }
 0xcd1   :  { %3616 = vmatmul.mubr.bf16.vlgmr.msra.gmra.mxu0 %v1366_v12 }
 0xcd2   :  { %3400 = vmatpush3.bf16.msra.mxu0 %v3911_v14 }
 0xcd3   :  { %3401 = vmatprep.subr.bf16.mxu0 %v3912_v15  ;;  %v3927_v15 = vld [vmem:[#allocation10 + $0xb0] sm:$0xff]  }
 0xcd6   :  { %3402 = vmatpush3.bf16.msra.mxu0 %v3913_v16 }
 0xcd7   :  { %3403 = vmatprep.subr.bf16.mxu0 %v3914_v17  ;;  %v3172_v17 = vld [vmem:[%s4814_s4 + $0x2] ss:$0 sm:$0xff] }
 0xcda   :  { %3404 = vmatpush3.bf16.msra.mxu0 %v3915_v18 }
 0xcdb   :  { %3405 = vmatprep.subr.bf16.mxu0 %v3916_v19 }
 0xcde   :  { %3406 = vmatpush3.bf16.msra.mxu0 %v3917_v20 }
 0xcdf   :  { %3407 = vmatprep.subr.bf16.mxu0 %v3918_v21 }
 0xce2   :  { %3408 = vmatpush3.bf16.msra.mxu0 %v3919_v22 }
 0xce3   :  { %3409 = vmatprep.subr.bf16.mxu0 %v3920_v23 }
 0xce6   :  { %3410 = vmatpush3.bf16.msra.mxu0 %v3921_v24 }
 0xce7   :  { %3411 = vmatprep.subr.bf16.mxu0 %v3922_v54 }
 0xcea   :  { %3412 = vmatpush3.bf16.msra.mxu0 %v3923_v7 }
 0xceb   :  { %3413 = vmatprep.subr.bf16.mxu0 %v3924_v8 }
 0xcee   :  { %3414 = vmatpush3.bf16.msra.mxu0 %v3925_v9 }
 0xcef   :  { %3645 = vmatprep.subr.bf16.mxu0 %v4268_v0 }
 0xd91   :  { %v1474_v28 = vpop.f32.mrf.mxu0 }
 0xd92   :  { %v1475_v31 = vadd.f32 %v3157_v25, %v1474_v28  ;;  %v3928_v28 = vld [vmem:[#allocation10 + $0xa8] sm:$0xff]  }
 0xd93   :  { %v3617_v32 = vpop.f32.mrf.mxu0 }
 0xd94   :  { %v1481_v35 = vmul.f32 0.2, %v1475_v31  ;;  %v3930_v32 = vld [vmem:[#allocation10 + $0x98] sm:$0xff]  }
 0xd95   :  { %v1477_v34 = vpop.f32.mrf.mxu0 }
 0xd96   :  { %v1478_v36 = vadd.f32 %v3157_v25, %v1477_v34  ;;  %v1483_v1 = vmax.f32 %v1475_v31, %v1481_v35  ;;  %v3929_v31 = vld [vmem:[#allocation10 + $0xa0] sm:$0xff]   ;;  %v3931_v34 = vld [vmem:[#allocation10 + $0x90] sm:$0xff]   ;;  %v3932_v35 = vld [vmem:[#allocation10 + $0x88] sm:$0xff]  }
 0xd97   :  { %v3618_v37 = vpop.f32.mrf.mxu0 }
 0xd98   :  { %v1482_v46 = vmul.f32 0.2, %v1478_v36 }
 0xd9a   :  { %v1484_v2 = vmax.f32 %v1478_v36, %v1482_v46  ;;  %v3933_v36 = vld [vmem:[#allocation10 + $0x80] sm:$0xff]  }
 0xd9c   :  { %v1485_v4 = vadd.f32 %v1484_v2, %v1483_v1 }
 0xd9e   :  { %v1486_v27 = vrot.slane %v1485_v4, 4 }
 0xda0   :  { %v1487_v39 = vadd.f32 %v1486_v27, %v1485_v4 }
 0xda2   :  { %v1488_v40 = vrot.slane %v1487_v39, 2 }
 0xda4   :  { %v1489_v29 = vadd.f32 %v1488_v40, %v1487_v39 }
 0xda6   :  { %v1490_v33 = vrot.slane %v1489_v29, 1 }
 0xda8   :  { %v1491_v38 = vadd.f32 %v1490_v33, %v1489_v29  ;;  %v3934_v33 = vld [vmem:[#allocation11 + $0x78] sm:$0xff]  }
 0xdaa   :  { %v1492_v45 = vmul.f32 0.0625, %v1491_v38  ;;  %v3935_v38 = vld [vmem:[#allocation11 + $0x38] sm:$0xff]  }
 0xdac   :  { %v1493_v41 = vsub.f32 %v1483_v1, %v1492_v45  ;;  %v1494_v47 = vsub.f32 %v1484_v2, %v1492_v45  ;;  %v3936_v45 = vld [vmem:[#allocation11 + $0x70] sm:$0xff]  }
 0xdae   :  { %v1495_v42 = vmul.f32 %v1493_v41, %v1493_v41  ;;  %v1496_v48 = vmul.f32 %v1494_v47, %v1494_v47 }
 0xdb0   :  { %v1497_v49 = vadd.f32 %v1496_v48, %v1495_v42  ;;  %v3939_v42 = vld [vmem:[#allocation11 + $0x28] sm:$0xff]   ;;  %v3940_v48 = vld [vmem:[#allocation11 + $0x60] sm:$0xff]  }
 0xdb2   :  { %v1498_v50 = vrot.slane %v1497_v49, 4 }
 0xdb4   :  { %v1499_v43 = vadd.f32 %v1498_v50, %v1497_v49  ;;  %v3941_v49 = vld [vmem:[#allocation11 + $0x20] sm:$0xff]   ;;  %v3942_v50 = vld [vmem:[#allocation11 + $0x58] sm:$0xff]  }
 0xdb6   :  { %v1500_v44 = vrot.slane %v1499_v43, 2 }
 0xdb8   :  { %v1501_v52 = vadd.f32 %v1500_v44, %v1499_v43  ;;  %v3943_v43 = vld [vmem:[#allocation11 + $0x18] sm:$0xff]   ;;  %v3944_v44 = vld [vmem:[#allocation11 + $0x50] sm:$0xff]  }
 0xdba   :  { %v1502_v53 = vrot.slane %v1501_v52, 1 }
 0xdbc   :  { %v1503_v55 = vadd.f32 %v1502_v53, %v1501_v52  ;;  %v3945_v52 = vld [vmem:[#allocation11 + $0x10] sm:$0xff]   ;;  %v3946_v53 = vld [vmem:[#allocation11 + $0x48] sm:$0xff]  }
 0xdbe   :  { %v1504_v56 = vmul.f32 0.0625, %v1503_v55  ;;  %v3947_v55 = vld [vmem:[#allocation11 + $0x8] sm:$0xff]  }
 0xdc0   :  { %v1505_v57 = vadd.f32 1e-05, %v1504_v56  ;;  %v3948_v56 = vld [vmem:[#allocation11 + $0x40] sm:$0xff]  }
 0xdc2   :  { %4030 = vrsqrt.f32 %v1505_v57  ;;  %v3949_v57 = vld [vmem:[#allocation11] sm:$0xff]  }
 0xdcf   :  { %v4031_v58 = vpop.eup %4030 }
 0xdd0   :  { %v1507_v60 = vmul.f32 %v4031_v58, %v1493_v41  ;;  %v1508_v61 = vmul.f32 %v4031_v58, %v1494_v47  ;;  %v3937_v41 = vld [vmem:[#allocation11 + $0x30] sm:$0xff]   ;;  %v3938_v47 = vld [vmem:[#allocation11 + $0x68] sm:$0xff]  }
 0xdd1   :  { %v3190_v58 = vld [vmem:[%s4816_s6 + $0x2] ss:$0 sm:$0xff] }
 0xdd2   :  { %v1517_v63 = vmul.f32 %v3167_v59, %v1507_v60  ;;  %v1518_v30 = vmul.f32 %v3167_v59, %v1508_v61 }
 0xdd4   :  { %v1527_v3 = vadd.f32 %v3169_v62, %v1517_v63  ;;  %v1528_v5 = vadd.f32 %v3169_v62, %v1518_v30 }
 0xdd6   :  { %v1529_v6 = vpack.c.bf16 %v1528_v5, %v1527_v3 }
 0xdd8   :  { %3620 = vmatpush3.bf16.msra.mxu1 %v1529_v6  ;;  %1741 = vmatprep.mubr.bf16.mxu0 %v1529_v6 }
 0xdd9   :  { %3625 = vmatprep.subr.bf16.mxu1 %v4268_v0 }
 0xddb   :  { %3622 = vmatmul.mubr.msk.bf16.vlgmr.msra.gmra.mxu1 %vm172_vm1, %v4597_v26  ;;  %v3926_v26 = vld [vmem:[#allocation10 + $0xb8] sm:$0xff]  }
 0xddc   :  { %3641 = vmatprep.mubr.msk.bf16.mxu1 %vm4269_vm0, %v4268_v0  ;;  %3626 = vmatpush3.bf16.msra.mxu1 %v3926_v26 }
 0xddd   :  { %3627 = vmatprep.subr.bf16.mxu1 %v4268_v0 }
 0xde0   :  { %3628 = vmatpush3.bf16.msra.mxu1 %v3927_v15 }
 0xde1   :  { %3629 = vmatprep.subr.bf16.mxu1 %v4268_v0 }
 0xde4   :  { %3630 = vmatpush3.bf16.msra.mxu1 %v3928_v28 }
 0xde5   :  { %3631 = vmatprep.subr.bf16.mxu1 %v4268_v0 }
 0xde8   :  { %3632 = vmatpush3.bf16.msra.mxu1 %v3929_v31 }
 0xde9   :  { %3633 = vmatprep.subr.bf16.mxu1 %v4268_v0 }
 0xdec   :  { %3634 = vmatpush3.bf16.msra.mxu1 %v3930_v32  ;;  %v3200_v32 = vld [vmem:[%s4817_s7 + $0x2] ss:$0 sm:$0xff] }
 0xded   :  { %3635 = vmatprep.subr.bf16.mxu1 %v4268_v0 }
 0xdf0   :  { %3636 = vmatpush3.bf16.msra.mxu1 %v3931_v34 }
 0xdf1   :  { %3637 = vmatprep.subr.bf16.mxu1 %v4268_v0 }
 0xdf4   :  { %3638 = vmatpush3.bf16.msra.mxu1 %v3932_v35 }
 0xdf5   :  { %3639 = vmatprep.subr.bf16.mxu1 %v4268_v0 }
 0xdf8   :  { %3640 = vmatpush3.bf16.msra.mxu1 %v3933_v36  ;;  %v3202_v36 = vld [vmem:[%s4818_s8 + $0x2] ss:$0 sm:$0xff] }
 0xdf9   :  { %3665 = vmatprep.subr.bf16.mxu1 %v4268_v0 }
 0xe9b   :  { %v1564_v10 = vpop.f32.mrf.mxu1 }
 0xe9d   :  { %v3623_v11 = vpop.f32.mrf.mxu1 }
 0xe9f   :  { %v1567_v12 = vpop.f32.mrf.mxu1 }
 0xea0   :  { %v1571_v13 = vpack.c.bf16 %v1567_v12, %v1564_v10 }
 0xea1   :  { %v3624_v14 = vpop.f32.mrf.mxu1 }
 0xea2   :  { %1742 = vmatmul.mubr.bf16.vlgmr.msra.gmra.mxu0 %v1571_v13 }
 0xea3   :  { %3661 = vmatprep.mubr.msk.bf16.mxu0 %vm4269_vm0, %v4268_v0  ;;  %3646 = vmatpush3.bf16.msra.mxu0 %v3934_v33 }
 0xea4   :  { %3647 = vmatprep.subr.bf16.mxu0 %v4268_v0 }
 0xea7   :  { %3648 = vmatpush3.bf16.msra.mxu0 %v3936_v45 }
 0xea8   :  { %3649 = vmatprep.subr.bf16.mxu0 %v4268_v0 }
 0xeab   :  { %3650 = vmatpush3.bf16.msra.mxu0 %v3938_v47 }
 0xeac   :  { %3651 = vmatprep.subr.bf16.mxu0 %v4268_v0 }
 0xeaf   :  { %3652 = vmatpush3.bf16.msra.mxu0 %v3940_v48  ;;  %v3951_v48 = vld [vmem:[#allocation11 + $0xf8] sm:$0xff]  }
 0xeb0   :  { %3653 = vmatprep.subr.bf16.mxu0 %v4268_v0 }
 0xeb3   :  { %3654 = vmatpush3.bf16.msra.mxu0 %v3942_v50 }
 0xeb4   :  { %3655 = vmatprep.subr.bf16.mxu0 %v4268_v0 }
 0xeb7   :  { %3656 = vmatpush3.bf16.msra.mxu0 %v3944_v44 }
 0xeb8   :  { %3657 = vmatprep.subr.bf16.mxu0 %v4268_v0 }
 0xebb   :  { %3658 = vmatpush3.bf16.msra.mxu0 %v3946_v53 }
 0xebc   :  { %3659 = vmatprep.subr.bf16.mxu0 %v4268_v0 }
 0xebf   :  { %3660 = vmatpush3.bf16.msra.mxu0 %v3948_v56 }
 0xec0   :  { %3685 = vmatprep.subr.bf16.mxu0 %v4268_v0 }
 0xf62   :  { %v3415_v16 = vpop.f32.mrf.mxu0 }
 0xf64   :  { %v3416_v18 = vpop.f32.mrf.mxu0 }
 0xf65   :  { %v3417_v19 = vadd.f32 %v3416_v18, %v3415_v16 }
 0xf66   :  { %v3418_v20 = vpop.f32.mrf.mxu0 }
 0xf67   :  { %v1744_v21 = vadd.f32 %v3417_v19, %v3172_v17 }
 0xf68   :  { %v3419_v22 = vpop.f32.mrf.mxu0 }
 0xf69   :  { %v3420_v23 = vadd.f32 %v3419_v22, %v3418_v20  ;;  %v1750_v24 = vmul.f32 %v1744_v21, %v1744_v21 }
 0xf6b   :  { %v1747_v54 = vadd.f32 %v3420_v23, %v3172_v17  ;;  %1752 = vadd.xlane.f32.xlu1 %v1750_v24 }
 0xf6d   :  { %v1751_v25 = vmul.f32 %v1747_v54, %v1747_v54 }
 0xf6f   :  { %1754 = vadd.xlane.f32.xlu1 %v1751_v25 }
 0xff4   :  { %v1753_v37 = vpop.xlane.xlu1 %1752 }
 0xff5   :  { %v1756_v46 = vmax.f32 %v1753_v37, 1e-24 }
 0xff7   :  { %4032 = vrsqrt.f32 %v1756_v46 }
 0xff8   :  { %v1755_v1 = vpop.xlane.xlu1 %1754 }
 0xff9   :  { %v1757_v2 = vmax.f32 %v1755_v1, 1e-24 }
 0xffb   :  { %4034 = vrsqrt.f32 %v1757_v2 }
0x1004   :  { %v4033_v4 = vpop.eup %4032 }
0x1005   :  { %v1760_v39 = vmul.f32 %v4033_v4, %v1744_v21 }
0x1008   :  { %v4035_v27 = vpop.eup %4034 }
0x1009   :  { %v1761_v40 = vmul.f32 %v4035_v27, %v1747_v54 }
0x100b   :  { %v1762_v29 = vpack.c.bf16 %v1761_v40, %v1760_v39 }
0x100d   :  { %3642 = vmatmul.mubr.bf16.vlgmr.msra.gmra.mxu1 %v1762_v29 }
0x100e   :  { %3681 = vmatprep.mubr.msk.bf16.mxu1 %vm4269_vm0, %v4268_v0  ;;  %3666 = vmatpush3.bf16.msra.mxu1 %v3935_v38 }
0x100f   :  { %3667 = vmatprep.subr.bf16.mxu1 %v4268_v0 }
0x1012   :  { %3668 = vmatpush3.bf16.msra.mxu1 %v3937_v41 }
0x1013   :  { %3669 = vmatprep.subr.bf16.mxu1 %v4268_v0 }
0x1016   :  { %3670 = vmatpush3.bf16.msra.mxu1 %v3939_v42  ;;  %v3950_v42 = vld [vmem:[#allocation11 + $0xb8] sm:$0xff]  }
0x1017   :  { %3671 = vmatprep.subr.bf16.mxu1 %v4268_v0 }
0x101a   :  { %3672 = vmatpush3.bf16.msra.mxu1 %v3941_v49 }
0x101b   :  { %3673 = vmatprep.subr.bf16.mxu1 %v4268_v0 }
0x101e   :  { %3674 = vmatpush3.bf16.msra.mxu1 %v3943_v43 }
0x101f   :  { %3675 = vmatprep.subr.bf16.mxu1 %v4268_v0 }
0x1022   :  { %3676 = vmatpush3.bf16.msra.mxu1 %v3945_v52 }
0x1023   :  { %3677 = vmatprep.subr.bf16.mxu1 %v4268_v0 }
0x1026   :  { %3678 = vmatpush3.bf16.msra.mxu1 %v3947_v55 }
0x1027   :  { %3679 = vmatprep.subr.bf16.mxu1 %v4268_v0 }
0x102a   :  { %3680 = vmatpush3.bf16.msra.mxu1 %v3949_v57 }
0x102b   :  { %3705 = vmatprep.subr.bf16.mxu1 %v4268_v0 }
0x10cd   :  { %v1870_v59 = vpop.f32.mrf.mxu1 }
0x10ce   :  { %v1871_v60 = vadd.f32 %v3190_v58, %v1870_v59  ;;  %v3953_v59 = vld [vmem:[#allocation11 + $0xf0] sm:$0xff]  }
0x10cf   :  { %v3643_v61 = vpop.f32.mrf.mxu1 }
0x10d0   :  { %v1877_v63 = vmul.f32 0.2, %v1871_v60 }
0x10d1   :  { %v1873_v62 = vpop.f32.mrf.mxu1 }
0x10d2   :  { %v1874_v30 = vadd.f32 %v3190_v58, %v1873_v62  ;;  %v1879_v6 = vmax.f32 %v1871_v60, %v1877_v63  ;;  %v3952_v58 = vld [vmem:[#allocation11 + $0xb0] sm:$0xff]   ;;  %v3954_v63 = vld [vmem:[#allocation11 + $0xa8] sm:$0xff]  }
0x10d3   :  { %v3644_v3 = vpop.f32.mrf.mxu1 }
0x10d4   :  { %v1878_v5 = vmul.f32 0.2, %v1874_v30  ;;  %v3956_v3 = vld [vmem:[#allocation11 + $0xa0] sm:$0xff]  }
0x10d6   :  { %v1880_v7 = vmax.f32 %v1874_v30, %v1878_v5  ;;  %v3955_v30 = vld [vmem:[#allocation11 + $0xe8] sm:$0xff]   ;;  %v3957_v5 = vld [vmem:[#allocation11 + $0xe0] sm:$0xff]  }
0x10d8   :  { %v1881_v8 = vadd.f32 %v1880_v7, %v1879_v6 }
0x10da   :  { %v1882_v9 = vrot.slane %v1881_v8, 4 }
0x10dc   :  { %v1883_v10 = vadd.f32 %v1882_v9, %v1881_v8  ;;  %v3960_v8 = vld [vmem:[#allocation11 + $0x90] sm:$0xff]  }
0x10dd   :  { %v3961_v9 = vld [vmem:[#allocation11 + $0xd0] sm:$0xff]  }
0x10de   :  { %v1884_v11 = vrot.slane %v1883_v10, 2 }
0x10e0   :  { %v1885_v12 = vadd.f32 %v1884_v11, %v1883_v10  ;;  %v3962_v10 = vld [vmem:[#allocation11 + $0x88] sm:$0xff]  }
0x10e1   :  { %v3963_v11 = vld [vmem:[#allocation11 + $0xc8] sm:$0xff]  }
0x10e2   :  { %v1886_v13 = vrot.slane %v1885_v12, 1 }
0x10e4   :  { %v1887_v14 = vadd.f32 %v1886_v13, %v1885_v12 }
0x10e6   :  { %v1888_v26 = vmul.f32 0.0625, %v1887_v14 }
0x10e8   :  { %v1889_v15 = vsub.f32 %v1879_v6, %v1888_v26  ;;  %v1890_v16 = vsub.f32 %v1880_v7, %v1888_v26  ;;  %v3958_v6 = vld [vmem:[#allocation11 + $0x98] sm:$0xff]  }
0x10e9   :  { %v3959_v7 = vld [vmem:[#allocation11 + $0xd8] sm:$0xff]  }
0x10ea   :  { %v1891_v17 = vmul.f32 %v1889_v15, %v1889_v15  ;;  %v1892_v18 = vmul.f32 %v1890_v16, %v1890_v16 }
0x10ec   :  { %v1893_v19 = vadd.f32 %v1892_v18, %v1891_v17 }
0x10ee   :  { %v1894_v20 = vrot.slane %v1893_v19, 4 }
0x10f0   :  { %v1895_v21 = vadd.f32 %v1894_v20, %v1893_v19  ;;  %v3966_v19 = vld [vmem:[#allocation11 + $0x138] sm:$0xff]  }
0x10f1   :  { %v3967_v20 = vld [vmem:[#allocation11 + $0x178] sm:$0xff]  }
0x10f2   :  { %v1896_v22 = vrot.slane %v1895_v21, 2 }
0x10f4   :  { %v1897_v23 = vadd.f32 %v1896_v22, %v1895_v21 }
0x10f6   :  { %v1898_v24 = vrot.slane %v1897_v23, 1 }
0x10f8   :  { %v1899_v54 = vadd.f32 %v1898_v24, %v1897_v23  ;;  %v3968_v23 = vld [vmem:[#allocation11 + $0x130] sm:$0xff]  }
0x10f9   :  { %v3969_v24 = vld [vmem:[#allocation11 + $0x170] sm:$0xff]  }
0x10fa   :  { %v1900_v25 = vmul.f32 0.0625, %v1899_v54  ;;  %v3970_v54 = vld [vmem:[#allocation11 + $0x128] sm:$0xff]  }
0x10fc   :  { %v1901_v28 = vadd.f32 1e-05, %v1900_v25  ;;  %v3971_v25 = vld [vmem:[#allocation11 + $0x168] sm:$0xff]  }
0x10fe   :  { %4036 = vrsqrt.f32 %v1901_v28  ;;  %v3972_v28 = vld [vmem:[#allocation11 + $0x120] sm:$0xff]  }
0x110b   :  { %v4037_v31 = vpop.eup %4036 }
0x110c   :  { %v1903_v34 = vmul.f32 %v4037_v31, %v1889_v15  ;;  %v1904_v35 = vmul.f32 %v4037_v31, %v1890_v16  ;;  %v3964_v15 = vld [vmem:[#allocation11 + $0x80] sm:$0xff]  }
0x110d   :  { %v3965_v16 = vld [vmem:[#allocation11 + $0xc0] sm:$0xff]  }
0x110e   :  { %v1913_v37 = vmul.f32 %v3200_v32, %v1903_v34  ;;  %v1914_v46 = vmul.f32 %v3200_v32, %v1904_v35  ;;  %v3973_v31 = vld [vmem:[#allocation11 + $0x160] sm:$0xff]   ;;  %v3974_v32 = vld [vmem:[#allocation11 + $0x118] sm:$0xff]   ;;  %v3976_v35 = vld [vmem:[#allocation11 + $0x110] sm:$0xff]  }
0x110f   :  { %v3975_v34 = vld [vmem:[#allocation11 + $0x158] sm:$0xff]  }
0x1110   :  { %v1923_v1 = vadd.f32 %v3202_v36, %v1913_v37  ;;  %v1924_v2 = vadd.f32 %v3202_v36, %v1914_v46  ;;  %v3977_v36 = vld [vmem:[#allocation11 + $0x150] sm:$0xff]   ;;  %v3978_v37 = vld [vmem:[#allocation11 + $0x108] sm:$0xff]  }
0x1111   :  { %v3979_v46 = vld [vmem:[#allocation11 + $0x148] sm:$0xff]  }
0x1112   :  { %v1925_v4 = vpack.c.bf16 %v1923_v1, %v1923_v1  ;;  %v1926_v27 = vpack.c.bf16 %v1924_v2, %v1924_v2  ;;  %v3980_v1 = vld [vmem:[#allocation11 + $0x100] sm:$0xff]  }
0x1113   :  { %v3981_v2 = vld [vmem:[#allocation11 + $0x140] sm:$0xff]  }
0x1114   :  { %v4672_v39 = vunpack.c.l.b16 %v1925_v4  ;;  %v4674_v40 = vunpack.c.l.b16 %v1926_v27  ;;  %v3982_v4 = vld [vmem:[#allocation11 + $0x1b8] sm:$0xff]  }
0x1115   :  { %v3983_v27 = vld [vmem:[#allocation11 + $0x1f8] sm:$0xff]  }
0x1116   :  { %v1964_v29 = vrot.slane %v4672_v39, 1  ;;  %v2057_v33 = vrot.slane %v4674_v40, 7  ;;  %v2388_v38 = vrot.slane %v4672_v39, 4  ;;  %v2389_v45 = vrot.slane %v4674_v40, 3 }
0x1117   :  { %v2499_v49 = vrot.slane %v4672_v39, 5  ;;  %v2500_v52 = vrot.slane %v4674_v40, 4  ;;  %v2610_v53 = vrot.slane %v4672_v39, 6  ;;  %v2611_v55 = vrot.slane %v4674_v40, 5 }
0x1118   :  { %v1966_v41 = vsel %vm1965_vm12, %v4674_v40, %v1964_v29  ;;  %v2058_v47 = vsel %vm1965_vm12, %v2057_v33, %v4672_v39  ;;  %v4686_v44 = vsel %vm1965_vm12, %v2389_v45, %v2388_v38  ;;  %v2721_v56 = vrot.slane %v4672_v39, 7  ;;  %v3984_v29 = vld [vmem:[#allocation11 + $0x1b0] sm:$0xff]   ;;  %v3986_v38 = vld [vmem:[#allocation11 + $0x1a8] sm:$0xff]  }
0x1119   :  { %v1967_v50 = vpack.c.b16 %v1966_v41, %v1966_v41  ;;  %v2059_v43 = vpack.c.b16 %v2058_v47, %v2058_v47  ;;  %v2722_v57 = vrot.slane %v4674_v40, 6  ;;  %v4694_v60 = vsel %vm1965_vm12, %v2500_v52, %v2499_v49  ;;  %v3985_v33 = vld [vmem:[#allocation11 + $0x1f0] sm:$0xff]   ;;  %v3987_v45 = vld [vmem:[#allocation11 + $0x1e8] sm:$0xff]   ;;  %v3988_v41 = vld [vmem:[#allocation11 + $0x1a0] sm:$0xff]  }
0x111a   :  { %v4699_v61 = vsel %vm1965_vm12, %v2611_v55, %v2610_v53  ;;  %v2166_v12 = vrot.slane %v4672_v39, 2  ;;  %v2167_v13 = vrot.slane %v4674_v40, 1  ;;  %v2277_v14 = vrot.slane %v4672_v39, 3  ;;  %v3989_v47 = vld [vmem:[#allocation11 + $0x1e0] sm:$0xff]   ;;  %v3992_v49 = vld [vmem:[#allocation11 + $0x190] sm:$0xff]  }
0x111b   :  { %3662 = vmatmul.mubr.bf16.vlgmr.msra.gmra.mxu0 %v1967_v50  ;;  %3682 = vmatmul.mubr.bf16.vlgmr.msra.gmra.mxu1 %v2059_v43  ;;  %v4702_v62 = vsel %vm1965_vm12, %v2722_v57, %v2721_v56  ;;  %v2278_v26 = vrot.slane %v4674_v40, 2  ;;  %v2391_v39 = vpack.c.b16 %v4686_v44, %v4686_v44  ;;  %v2502_v40 = vpack.c.b16 %v4694_v60, %v4694_v60  ;;  %v3993_v50 = vld [vmem:[#allocation11 + $0x1d0] sm:$0xff]   ;;  %v3994_v43 = vld [vmem:[#allocation11 + $0x188] sm:$0xff]   ;;  %v3996_v52 = vld [vmem:[#allocation11 + $0x180] sm:$0xff]  }
0x111c   :  { %3686 = vmatpush3.bf16.msra.mxu0 %v3950_v42  ;;  %3706 = vmatpush3.bf16.msra.mxu1 %v3951_v48  ;;  %v2168_v17 = vsel %vm1965_vm12, %v2167_v13, %v2166_v12  ;;  %v3990_v42 = vld [vmem:[#allocation11 + $0x198] sm:$0xff]   ;;  %v3995_v44 = vld [vmem:[#allocation11 + $0x1c8] sm:$0xff]   ;;  %v3997_v53 = vld [vmem:[#allocation11 + $0x1c0] sm:$0xff]   ;;  %v2613_v55 = vpack.c.b16 %v4699_v61, %v4699_v61  ;;  %v2724_v56 = vpack.c.b16 %v4702_v62, %v4702_v62 }
0x111d   :  { %3687 = vmatprep.subr.bf16.mxu0 %v4268_v0  ;;  %3707 = vmatprep.subr.bf16.mxu1 %v4268_v0  ;;  %v2279_v18 = vsel %vm1965_vm12, %v2278_v26, %v2277_v14  ;;  %v2169_v21 = vpack.c.b16 %v2168_v17, %v2168_v17  ;;  %v3991_v48 = vld [vmem:[#allocation11 + $0x1d8] sm:$0xff]   ;;  %v4001_v60 = vld [vmem:[#allocation13 + $0x20] sm:$0xff]   ;;  %v4003_v62 = vld [vmem:[#allocation13 + $0x10] sm:$0xff]  }
0x111e   :  { %3701 = vmatprep.mubr.msk.bf16.mxu0 %vm4269_vm0, %v4268_v0  ;;  %3721 = vmatprep.mubr.msk.bf16.mxu1 %vm4269_vm0, %v4268_v0  ;;  %v2280_v22 = vpack.c.b16 %v2279_v18, %v2279_v18  ;;  %v3998_v57 = vld [vmem:[#allocation13 + $0x38] sm:$0xff]  }
0x111f   :  { %v4002_v61 = vld [vmem:[#allocation13 + $0x18] sm:$0xff]  }
0x1120   :  { %3688 = vmatpush3.bf16.msra.mxu0 %v3952_v58  ;;  %3708 = vmatpush3.bf16.msra.mxu1 %v3953_v59  ;;  %v3999_v58 = vld [vmem:[#allocation13 + $0x30] sm:$0xff]   ;;  %v4000_v59 = vld [vmem:[#allocation13 + $0x28] sm:$0xff]  }
0x1121   :  { %3689 = vmatprep.subr.bf16.mxu0 %v4268_v0  ;;  %3709 = vmatprep.subr.bf16.mxu1 %v4268_v0 }
0x1124   :  { %3690 = vmatpush3.bf16.msra.mxu0 %v3954_v63  ;;  %3710 = vmatpush3.bf16.msra.mxu1 %v3955_v30  ;;  %v4004_v63 = vld [vmem:[#allocation13 + $0x8] sm:$0xff]   ;;  %v4005_v30 = vld [vmem:[#allocation13] sm:$0xff]  }
0x1125   :  { %3691 = vmatprep.subr.bf16.mxu0 %v4268_v0  ;;  %3711 = vmatprep.subr.bf16.mxu1 %v4268_v0 }
0x1128   :  { %3692 = vmatpush3.bf16.msra.mxu0 %v3956_v3  ;;  %3712 = vmatpush3.bf16.msra.mxu1 %v3957_v5  ;;  %v4006_v3 = vld [vmem:[#allocation14 + $0x38] sm:$0xff]   ;;  %v4007_v5 = vld [vmem:[#allocation14 + $0x30] sm:$0xff]  }
0x1129   :  { %3693 = vmatprep.subr.bf16.mxu0 %v4268_v0  ;;  %3713 = vmatprep.subr.bf16.mxu1 %v4268_v0 }
0x112c   :  { %3694 = vmatpush3.bf16.msra.mxu0 %v3958_v6  ;;  %3714 = vmatpush3.bf16.msra.mxu1 %v3959_v7  ;;  %v4008_v6 = vld [vmem:[#allocation14 + $0x28] sm:$0xff]   ;;  %v4009_v7 = vld [vmem:[#allocation14 + $0x20] sm:$0xff]  }
0x112d   :  { %3695 = vmatprep.subr.bf16.mxu0 %v4268_v0  ;;  %3715 = vmatprep.subr.bf16.mxu1 %v4268_v0 }
0x1130   :  { %3696 = vmatpush3.bf16.msra.mxu0 %v3960_v8  ;;  %3716 = vmatpush3.bf16.msra.mxu1 %v3961_v9  ;;  %v4010_v8 = vld [vmem:[#allocation14 + $0x18] sm:$0xff]   ;;  %v4011_v9 = vld [vmem:[#allocation14 + $0x10] sm:$0xff]  }
0x1131   :  { %3697 = vmatprep.subr.bf16.mxu0 %v4268_v0  ;;  %3717 = vmatprep.subr.bf16.mxu1 %v4268_v0 }
0x1134   :  { %3698 = vmatpush3.bf16.msra.mxu0 %v3962_v10  ;;  %3718 = vmatpush3.bf16.msra.mxu1 %v3963_v11 }
0x1135   :  { %3699 = vmatprep.subr.bf16.mxu0 %v4268_v0  ;;  %3719 = vmatprep.subr.bf16.mxu1 %v4268_v0 }
0x1138   :  { %3700 = vmatpush3.bf16.msra.mxu0 %v3964_v15  ;;  %3720 = vmatpush3.bf16.msra.mxu1 %v3965_v16 }
0x1139   :  { %3725 = vmatprep.subr.bf16.mxu0 %v4268_v0  ;;  %3745 = vmatprep.subr.bf16.mxu1 %v4268_v0 }
0x113b   :  { %3702 = vmatmul.mubr.bf16.vlgmr.msra.gmra.mxu0 %v2169_v21  ;;  %3722 = vmatmul.mubr.bf16.vlgmr.msra.gmra.mxu1 %v2280_v22 }
0x113c   :  { %3726 = vmatpush3.bf16.msra.mxu0 %v3966_v19  ;;  %3746 = vmatpush3.bf16.msra.mxu1 %v3967_v20 }
0x113d   :  { %3727 = vmatprep.subr.bf16.mxu0 %v4268_v0  ;;  %3747 = vmatprep.subr.bf16.mxu1 %v4268_v0 }
0x113e   :  { %3741 = vmatprep.mubr.msk.bf16.mxu0 %vm4269_vm0, %v4268_v0  ;;  %3761 = vmatprep.mubr.msk.bf16.mxu1 %vm4269_vm0, %v4268_v0 }
0x1140   :  { %3728 = vmatpush3.bf16.msra.mxu0 %v3968_v23  ;;  %3748 = vmatpush3.bf16.msra.mxu1 %v3969_v24 }
0x1141   :  { %3729 = vmatprep.subr.bf16.mxu0 %v4268_v0  ;;  %3749 = vmatprep.subr.bf16.mxu1 %v4268_v0 }
0x1144   :  { %3730 = vmatpush3.bf16.msra.mxu0 %v3970_v54  ;;  %3750 = vmatpush3.bf16.msra.mxu1 %v3971_v25 }
0x1145   :  { %3731 = vmatprep.subr.bf16.mxu0 %v4268_v0  ;;  %3751 = vmatprep.subr.bf16.mxu1 %v4268_v0 }
0x1148   :  { %3732 = vmatpush3.bf16.msra.mxu0 %v3972_v28  ;;  %3752 = vmatpush3.bf16.msra.mxu1 %v3973_v31 }
0x1149   :  { %3733 = vmatprep.subr.bf16.mxu0 %v4268_v0  ;;  %3753 = vmatprep.subr.bf16.mxu1 %v4268_v0 }
0x114c   :  { %3734 = vmatpush3.bf16.msra.mxu0 %v3974_v32  ;;  %3754 = vmatpush3.bf16.msra.mxu1 %v3975_v34 }
0x114d   :  { %3735 = vmatprep.subr.bf16.mxu0 %v4268_v0  ;;  %3755 = vmatprep.subr.bf16.mxu1 %v4268_v0 }
0x1150   :  { %3736 = vmatpush3.bf16.msra.mxu0 %v3976_v35  ;;  %3756 = vmatpush3.bf16.msra.mxu1 %v3977_v36 }
0x1151   :  { %3737 = vmatprep.subr.bf16.mxu0 %v4268_v0  ;;  %3757 = vmatprep.subr.bf16.mxu1 %v4268_v0 }
0x1154   :  { %3738 = vmatpush3.bf16.msra.mxu0 %v3978_v37  ;;  %3758 = vmatpush3.bf16.msra.mxu1 %v3979_v46 }
0x1155   :  { %3739 = vmatprep.subr.bf16.mxu0 %v4268_v0  ;;  %3759 = vmatprep.subr.bf16.mxu1 %v4268_v0 }
0x1158   :  { %3740 = vmatpush3.bf16.msra.mxu0 %v3980_v1  ;;  %3760 = vmatpush3.bf16.msra.mxu1 %v3981_v2 }
0x1159   :  { %3765 = vmatprep.subr.bf16.mxu0 %v4268_v0  ;;  %3785 = vmatprep.subr.bf16.mxu1 %v4268_v0 }
0x115b   :  { %3742 = vmatmul.mubr.bf16.vlgmr.msra.gmra.mxu0 %v2391_v39  ;;  %3762 = vmatmul.mubr.bf16.vlgmr.msra.gmra.mxu1 %v2502_v40 }
0x115c   :  { %3766 = vmatpush3.bf16.msra.mxu0 %v3982_v4  ;;  %3786 = vmatpush3.bf16.msra.mxu1 %v3983_v27 }
0x115d   :  { %3767 = vmatprep.subr.bf16.mxu0 %v4268_v0  ;;  %3787 = vmatprep.subr.bf16.mxu1 %v4268_v0 }
0x115e   :  { %3781 = vmatprep.mubr.msk.bf16.mxu0 %vm4269_vm0, %v4268_v0  ;;  %3801 = vmatprep.mubr.msk.bf16.mxu1 %vm4269_vm0, %v4268_v0 }
0x1160   :  { %3768 = vmatpush3.bf16.msra.mxu0 %v3984_v29  ;;  %3788 = vmatpush3.bf16.msra.mxu1 %v3985_v33  ;;  %v3267_v29 = vld [vmem:[%s4820_s10] ss:$0 sm:$0xff] }
0x1161   :  { %3769 = vmatprep.subr.bf16.mxu0 %v4268_v0  ;;  %3789 = vmatprep.subr.bf16.mxu1 %v4268_v0 }
0x1164   :  { %3770 = vmatpush3.bf16.msra.mxu0 %v3986_v38  ;;  %3790 = vmatpush3.bf16.msra.mxu1 %v3987_v45 }
0x1165   :  { %3771 = vmatprep.subr.bf16.mxu0 %v4268_v0  ;;  %3791 = vmatprep.subr.bf16.mxu1 %v4268_v0 }
0x1168   :  { %3772 = vmatpush3.bf16.msra.mxu0 %v3988_v41  ;;  %3792 = vmatpush3.bf16.msra.mxu1 %v3989_v47 }
0x1169   :  { %3773 = vmatprep.subr.bf16.mxu0 %v4268_v0  ;;  %3793 = vmatprep.subr.bf16.mxu1 %v4268_v0 }
0x116c   :  { %3774 = vmatpush3.bf16.msra.mxu0 %v3990_v42  ;;  %3794 = vmatpush3.bf16.msra.mxu1 %v3991_v48 }
0x116d   :  { %3775 = vmatprep.subr.bf16.mxu0 %v4268_v0  ;;  %3795 = vmatprep.subr.bf16.mxu1 %v4268_v0 }
0x1170   :  { %3776 = vmatpush3.bf16.msra.mxu0 %v3992_v49  ;;  %3796 = vmatpush3.bf16.msra.mxu1 %v3993_v50 }
0x1171   :  { %3777 = vmatprep.subr.bf16.mxu0 %v4268_v0  ;;  %3797 = vmatprep.subr.bf16.mxu1 %v4268_v0 }
0x1174   :  { %3778 = vmatpush3.bf16.msra.mxu0 %v3994_v43  ;;  %3798 = vmatpush3.bf16.msra.mxu1 %v3995_v44 }
0x1175   :  { %3779 = vmatprep.subr.bf16.mxu0 %v4268_v0  ;;  %3799 = vmatprep.subr.bf16.mxu1 %v4268_v0 }
0x1178   :  { %3780 = vmatpush3.bf16.msra.mxu0 %v3996_v52  ;;  %3800 = vmatpush3.bf16.msra.mxu1 %v3997_v53  ;;  %v4012_v52 = vld [vmem:[#allocation14 + $0x8] sm:$0xff]   ;;  %v4013_v53 = vld [vmem:[#allocation14] sm:$0xff]  }
0x1179   :  { %3805 = vmatprep.subr.bf16.mxu0 %v4268_v0  ;;  %3825 = vmatprep.subr.bf16.mxu1 %v4268_v0 }
0x117b   :  { %3782 = vmatmul.mubr.bf16.vlgmr.msra.gmra.mxu0 %v2613_v55  ;;  %3802 = vmatmul.mubr.bf16.vlgmr.msra.gmra.mxu1 %v2724_v56  ;;  %v3268_v55 = vld [vmem:[%s4822_s12] ss:$0 sm:$0xff]  ;;  %s4270_s12 = smov [#allocation16]  }
0x117c   :  { %3821 = vmatprep.mubr.msk.bf16.mxu0 %vm4269_vm0, %v4268_v0  ;;  %3841 = vmatprep.mubr.msk.bf16.mxu1 %vm4269_vm0, %v4268_v0 }
0x117d   :  { %3806 = vmatpush3.bf16.msra.mxu0 %v3998_v57  ;;  %3826 = vmatpush3.bf16.msra.mxu1 %v4006_v3 }
0x117e   :  { %3807 = vmatprep.subr.bf16.mxu0 %v4268_v0  ;;  %3827 = vmatprep.subr.bf16.mxu1 %v4268_v0 }
0x1181   :  { %3808 = vmatpush3.bf16.msra.mxu0 %v3999_v58  ;;  %3828 = vmatpush3.bf16.msra.mxu1 %v4007_v5 }
0x1182   :  { %3809 = vmatprep.subr.bf16.mxu0 %v4268_v0  ;;  %3829 = vmatprep.subr.bf16.mxu1 %v4268_v0 }
0x1185   :  { %3810 = vmatpush3.bf16.msra.mxu0 %v4000_v59  ;;  %3830 = vmatpush3.bf16.msra.mxu1 %v4008_v6 }
0x1186   :  { %3811 = vmatprep.subr.bf16.mxu0 %v4268_v0  ;;  %3831 = vmatprep.subr.bf16.mxu1 %v4268_v0 }
0x1189   :  { %3812 = vmatpush3.bf16.msra.mxu0 %v4001_v60  ;;  %3832 = vmatpush3.bf16.msra.mxu1 %v4009_v7 }
0x118a   :  { %3813 = vmatprep.subr.bf16.mxu0 %v4268_v0  ;;  %3833 = vmatprep.subr.bf16.mxu1 %v4268_v0 }
0x118d   :  { %3814 = vmatpush3.bf16.msra.mxu0 %v4002_v61  ;;  %3834 = vmatpush3.bf16.msra.mxu1 %v4010_v8 }
0x118e   :  { %3815 = vmatprep.subr.bf16.mxu0 %v4268_v0  ;;  %3835 = vmatprep.subr.bf16.mxu1 %v4268_v0 }
0x1191   :  { %3816 = vmatpush3.bf16.msra.mxu0 %v4003_v62  ;;  %3836 = vmatpush3.bf16.msra.mxu1 %v4011_v9 }
0x1192   :  { %3817 = vmatprep.subr.bf16.mxu0 %v4268_v0  ;;  %3837 = vmatprep.subr.bf16.mxu1 %v4268_v0 }
0x1195   :  { %3818 = vmatpush3.bf16.msra.mxu0 %v4004_v63  ;;  %3838 = vmatpush3.bf16.msra.mxu1 %v4012_v52 }
0x1196   :  { %3819 = vmatprep.subr.bf16.mxu0 %v4268_v0  ;;  %3839 = vmatprep.subr.bf16.mxu1 %v4268_v0  ;;  %v3277_v0 = vld [vmem:[%s4824_s14] ss:$0 sm:$0xff]  ;;  %s3073_s14 = sshll.u32 %s4270_s12, 4  ;;  %s3074_s14 = int_to_ptr.vmem [resolvable:$true] %s3073_s14 }
0x1197   :  { %s4202_s18 = scalar_lea.vmem %s3074_s14, 32  ;;  %p4207_p13 = scmp.lt.s32.totalorder %s3074_s14, %s3074_s14 }
0x1198   :  { %p4203_p12 = scmp.ne.s32.totalorder %s3074_s14, %s4202_s18  ;;  %p4208_p0 = scmp.lt.s32.totalorder %s4202_s18, %s4202_s18 }
0x1199   :  { %3820 = vmatpush3.bf16.msra.mxu0 %v4005_v30  ;;  %3840 = vmatpush3.bf16.msra.mxu1 %v4013_v53 }
0x119a   :  { %p4209_p1 = por %p4208_p0, %p4207_p13 }
0x119c   :  { %p4210_p2 = pnand %p4209_p1, %p4203_p12 }
0x11db   :  { %v2051_v10 = vpop.f32.mrf.mxu0  ;;  %v2143_v11 = vpop.f32.mrf.mxu1 }
0x11dc   :  { %v2144_v12 = vadd.f32 %v2143_v11, %v2051_v10 }
0x11dd   :  { %v3663_v13 = vpop.f32.mrf.mxu0  ;;  %v3683_v14 = vpop.f32.mrf.mxu1 }
0x11df   :  { %v2054_v26 = vpop.f32.mrf.mxu0  ;;  %v2146_v15 = vpop.f32.mrf.mxu1 }
0x11e1   :  { %v3664_v16 = vpop.f32.mrf.mxu0  ;;  %v3684_v17 = vpop.f32.mrf.mxu1 }
0x11fb   :  { %v2253_v18 = vpop.f32.mrf.mxu0  ;;  %v2364_v19 = vpop.f32.mrf.mxu1 }
0x11fc   :  { %v2259_v46 = vadd.f32 %v2253_v18, %v2144_v12 }
0x11fd   :  { %v3703_v20 = vpop.f32.mrf.mxu0  ;;  %v3723_v21 = vpop.f32.mrf.mxu1 }
0x11fe   :  { %v2370_v1 = vadd.f32 %v2364_v19, %v2259_v46 }
0x11ff   :  { %v2256_v22 = vpop.f32.mrf.mxu0  ;;  %v2367_v23 = vpop.f32.mrf.mxu1 }
0x1201   :  { %v3704_v24 = vpop.f32.mrf.mxu0  ;;  %v3724_v54 = vpop.f32.mrf.mxu1 }
0x121b   :  { %v2475_v25 = vpop.f32.mrf.mxu0  ;;  %v2586_v28 = vpop.f32.mrf.mxu1 }
0x121c   :  { %v2481_v2 = vadd.f32 %v2475_v25, %v2370_v1 }
0x121d   :  { %v3743_v31 = vpop.f32.mrf.mxu0  ;;  %v3763_v32 = vpop.f32.mrf.mxu1 }
0x121e   :  { %v2592_v4 = vadd.f32 %v2586_v28, %v2481_v2 }
0x121f   :  { %v2478_v34 = vpop.f32.mrf.mxu0  ;;  %v2589_v35 = vpop.f32.mrf.mxu1 }
0x1221   :  { %v3744_v36 = vpop.f32.mrf.mxu0  ;;  %v3764_v37 = vpop.f32.mrf.mxu1 }
0x123b   :  { %v2697_v27 = vpop.f32.mrf.mxu0  ;;  %v2808_v39 = vpop.f32.mrf.mxu1 }
0x123c   :  { %v2703_v40 = vadd.f32 %v2697_v27, %v2592_v4 }
0x123d   :  { %v3783_v33 = vpop.f32.mrf.mxu0  ;;  %v3803_v38 = vpop.f32.mrf.mxu1 }
0x123e   :  { %v2814_v45 = vadd.f32 %v2808_v39, %v2703_v40 }
0x123f   :  { %v2700_v41 = vpop.f32.mrf.mxu0  ;;  %v2811_v47 = vpop.f32.mrf.mxu1 }
0x1240   :  { %v2822_v42 = vadd.f32 %v3267_v29, %v2814_v45 }
0x1241   :  { %v3784_v48 = vpop.f32.mrf.mxu0  ;;  %v3804_v49 = vpop.f32.mrf.mxu1 }
0x1242   :  { %v2823_v50 = vmul.f32 0.2, %v2822_v42 }
0x1244   :  { %v2824_v43 = vmax.f32 %v2822_v42, %v2823_v50 }
0x1246   :  { %v2825_v44 = vpack.c.bf16 %v2824_v43, %v2824_v43 }
0x1248   :  { %3822 = vmatmul.mubr.bf16.vlgmr.msra.gmra.mxu0 %v2825_v44 }
0x1308   :  { %v2931_v56 = vpop.f32.mrf.mxu0 }
0x1309   :  { %v2932_v57 = vadd.f32 %v3268_v55, %v2931_v56 }
0x130a   :  { %v3823_v58 = vpop.f32.mrf.mxu0 }
0x130b   :  { %v2937_v59 = vmul.f32 0.2, %v2932_v57 }
0x130c   :  { %v2934_v60 = vpop.f32.mrf.mxu0 }
0x130d   :  { %v2938_v61 = vmax.f32 %v2932_v57, %v2937_v59 }
0x130e   :  { %v3824_v62 = vpop.f32.mrf.mxu0 }
0x130f   :  { %v2940_v63 = vpack.c.bf16 %v2938_v61, %v2938_v61  ;;  %2939 = vst [vmem:[#allocation16] sm:$0x3] %v2938_v61 }
0x1311   :  { %3842 = vmatmul.mubr.bf16.vlgmr.msra.gmra.mxu1 %v2940_v63 }
0x13d1   :  { %v3046_v30 = vpop.f32.mrf.mxu1 }
0x13d2   :  { %v3047_v3 = vadd.f32 %v3277_v0, %v3046_v30 }
0x13d3   :  { %v3843_v5 = vpop.f32.mrf.mxu1 }
0x13d4   :  { %v3053_v6 = vsel %vm3052_vm13, %v3047_v3, -1e+30 }
0x13d5   :  { %v3049_v7 = vpop.f32.mrf.mxu1  ;;  %v3055_v8 = vsel %vm3054_vm14, %v3053_v6, -inf }
0x13d6   :  { %3056 = vmax.xlane.f32.xlu1 %v3055_v8 }
0x13d7   :  { %v3844_v9 = vpop.f32.mrf.mxu1 }
0x145f   :  { %v3057_v10 = vpop.xlane.xlu1 %3056 }
0x1460   :  { %v3058_v11 = vsub.f32 %v3053_v6, %v3057_v10 }
0x1462   :  { %v3059_v12 = vmul.f32 1.442695, %v3058_v11 }
0x1464   :  { %4038 = vpow2.f32 %v3059_v12 }
0x1471   :  { %v4039_v13 = vpop.eup %4038 }
0x1472   :  { %v3061_v14 = vsel %vm3054_vm14, %v4039_v13, 0.0 }
0x1473   :  { %3062 = vadd.xlane.f32.xlu1 %v3061_v14 }
0x1474   :  { %4213 = shalt.err (!%p4210_p2)
}
0x1475   :  { %3076 = dma.vmem_to_hbm [thread:$0]  %s3074_s14, 32, %s4825_s15, [#allocation4]  }
0x1476   :  { %s4271_s20 = smov [#allocation17]  }
0x1477   :  { %s3083_s1 = sshll.u32 %s4271_s20, 4  ;;  %s3084_s1 = int_to_ptr.vmem [resolvable:$true] %s3083_s1 }
0x1478   :  { %s4222_s21 = scalar_lea.vmem %s3084_s1, 32  ;;  %p4227_p4 = scmp.lt.s32.totalorder %s3084_s1, %s3084_s1 }
0x1479   :  { %p4223_p3 = scmp.ne.s32.totalorder %s3084_s1, %s4222_s21  ;;  %p4228_p5 = scmp.lt.s32.totalorder %s4222_s21, %s4222_s21 }
0x147b   :  { %p4229_p6 = por %p4228_p5, %p4227_p4 }
0x147d   :  { %p4230_p7 = pnand %p4229_p6, %p4223_p3 }
0x14fc   :  { %v3063_v51 = vpop.xlane.xlu1 %3062 }
0x14fd   :  { %4040 = vrcp.f32 %v3063_v51 }
0x150a   :  { %v4041_v26 = vpop.eup %4040 }
0x150b   :  { %v3065_v15 = vmul.f32 %v4041_v26, %v4039_v13 }
0x150d   :  { %3066 = vst [vmem:[#allocation17] sm:$0x3] %v3065_v15 }
0x150e   :  { %4233 = shalt.err (!%p4230_p7)
}
0x150f   :  { %3086 = dma.vmem_to_hbm [thread:$0]  %s3084_s1, 32, %s4826_s16, [#allocation18]  }
0x1510   :  { %4252 = dma.done.wait [#allocation4], 32  }
0x1511   :  { %4253 = vsyncadd [#allocation4], 4294967264 }
0x1512   :  { %4254 = dma.done.wait [#allocation18], 32  }
0x1513   :  { %4255 = vsyncadd [#allocation18], 4294967264 }
0x1514   :  { %3093 = vsyncpa [#allocation3], 1 }
0x1515   :  { %3094 = vsyncpa [#allocation6], 1 }
0x1516   :  { %3095 = vsyncpa [#allocation9], 1 }
0x1517   :  { %3096 = vsyncpa [#allocation12], 1 }
0x1518   :  { %3097 = vsyncpa [#allocation15], 1 }
0x1519   :  { %3098 = vsyncpa [#allocation4], 1 }
0x151a   :  { %3099 = vsyncpa [#allocation18], 1 }

</bundles_post_ra>
